<compile_context>
chip_gen: v7x
topology: tpu7x:2x2x1
jax: 0.10.0
libtpu: 0.0.40
codegen_flags: <defaults>
</compile_context>

<pallas_src>
import functools

import numpy as np
import jax
import jax.numpy as jnp
from jax.experimental import pallas as pl
from jax.experimental.pallas import tpu as pltpu

EPS = 1e-5


# ----------------------------------------------------------------------------
# VMEM budget / tile-size helpers
# ----------------------------------------------------------------------------
def _vmem_config():
    """(scoped vmem_limit_bytes, per-grid-step tile budget), per generation."""
    try:
        cap = pltpu.get_tpu_info().vmem_capacity_bytes
    except Exception:  # not a TPU / API unavailable: assume smallest (v7x)
        cap = 64 * 1024 * 1024
    if cap >= 128 * 1024 * 1024:                 # v5e / v6e: 128 MiB physical
        return 96 * 1024 * 1024, 30 * 1024 * 1024
    return 44 * 1024 * 1024, 12 * 1024 * 1024    # v7x: 64 MiB per TensorCore


def _pick_batch_tile(n, per_img_bytes, budget_bytes):
    """Largest batch tile dividing n that fits the budget, preferring a grid of
    >= 2 steps (keeps both v7x cores busy and gives the DMA pipeline depth)."""
    cap = min(n, max(1, budget_bytes // max(1, per_img_bytes)))
    best = 1
    for t in range(cap, 0, -1):
        if n % t:
            continue
        best = max(best, t)
        if n // t >= 2:
            return t
    return best


# ----------------------------------------------------------------------------
# Fused Bottleneck kernel (one batch tile per grid step)
# ----------------------------------------------------------------------------
def _bottleneck_kernel(*refs, ho, wo, stride, project, has_xs):
    """conv1(1x1)+ReLU -> conv2(3x3,stride)+ReLU -> conv3(1x1) -> +shortcut -> ReLU.

    refs: x, [xs], w1, b1, w2, b2, w3, b3, [ws, bs], out, xp_scratch
      x  : (TB, H, W, Cin)  bf16
      xs : (TB, Ho, Wo, Cin) bf16   (only project & stride>1)
      w* : bf16 (BN folded), b*: (1, C) f32
      out: (TB, Ho, Wo, Cout) bf16
      xp_scratch: (TB, Hp, Wp, P) bf16 zero-padded conv1 output (VMEM)
    """
    it = iter(refs)
    x_ref = next(it)
    xs_ref = next(it) if has_xs else None
    w1_ref = next(it); b1_ref = next(it)
    w2_ref = next(it); b2_ref = next(it)
    w3_ref = next(it); b3_ref = next(it)
    if project:
        ws_ref = next(it); bs_ref = next(it)
    o_ref = next(it)
    xp_scr = next(it)

    tb, h, w, cin = x_ref.shape
    p = w1_ref.shape[1]
    cout = o_ref.shape[3]
    m = tb * ho * wo

    # ---- conv1 (1x1) + folded BN + ReLU, into zero-padded VMEM scratch ------
    x = x_ref[...]
    h1 = jnp.dot(x.reshape(tb * h * w, cin), w1_ref[...],
                 preferred_element_type=jnp.float32)
    h1 = jnp.maximum(h1 + b1_ref[...], 0.0).astype(jnp.bfloat16)
    xp_scr[...] = jnp.zeros_like(xp_scr)            # border (and parity slack) = 0
    xp_scr[:, 1:1 + h, 1:1 + w, :] = h1.reshape(tb, h, w, p)
    xp = xp_scr[...]

    # ---- 3x3 taps: contiguous slices; polyphase planes when strided ---------
    if stride == 1:
        def tap(ky, kx):
            return xp[:, ky:ky + ho, kx:kx + wo, :]
    else:
        r = xp.reshape(tb, ho + 1, stride, wo + 1, stride, p)
        planes = [[r[:, :, py, :, px, :] for px in range(stride)]
                  for py in range(stride)]          # 4 phase-plane copies total

        def tap(ky, kx):
            ph = planes[ky % stride][kx % stride]
            oy, ox = ky // stride, kx // stride
            return ph[:, oy:oy + ho, ox:ox + wo, :]

    # ---- conv2 (3x3) as 3 accumulated dots (K = 3*P each), f32 accumulate ---
    acc2 = None
    for ky in range(3):
        pat = jnp.concatenate(
            [tap(ky, kx).reshape(m, p) for kx in range(3)], axis=-1)
        d = jnp.dot(pat, w2_ref[ky * 3 * p:(ky + 1) * 3 * p, :],
                    preferred_element_type=jnp.float32)
        acc2 = d if acc2 is None else acc2 + d
    h2 = jnp.maximum(acc2 + b2_ref[...], 0.0).astype(jnp.bfloat16)

    # ---- conv3 (1x1) ---------------------------------------------------------
    out = jnp.dot(h2, w3_ref[...], preferred_element_type=jnp.float32)
    out = out + b3_ref[...]

    # ---- shortcut + residual add + ReLU -------------------------------------
    if project:
        xs = (xs_ref[...] if has_xs else x).reshape(m, -1)
        out = out + jnp.dot(xs, ws_ref[...],
                            preferred_element_type=jnp.float32) + bs_ref[...]
    else:
        out = out + x.reshape(m, cin).astype(jnp.float32)

    o_ref[...] = jnp.maximum(out, 0.0).reshape(tb, ho, wo, cout).astype(o_ref.dtype)


# ----------------------------------------------------------------------------
# Wrapper: tiling over batch, one pallas_call for the whole block
# ----------------------------------------------------------------------------
def fused_bottleneck(x_nhwc, kp, *, stride, project, out_dtype=jnp.bfloat16):
    assert stride in (1, 2), "ResNet Bottleneck uses stride 1 or 2"
    n, h, w, cin = x_nhwc.shape
    p = kp["w1"].shape[1]
    cout = kp["w3"].shape[1]
    ho = (h - 1) // stride + 1
    wo = (w - 1) // stride + 1
    if stride == 1:
        hp_h, hp_w = h + 2, w + 2
    else:                                   # even size so polyphase reshape works
        hp_h, hp_w = stride * (ho + 1), stride * (wo + 1)

    x = x_nhwc.astype(jnp.bfloat16)
    has_xs = project and stride > 1

    vmem_limit, tile_budget = _vmem_config()
    odt = jnp.dtype(out_dtype).itemsize
    per_img = (
        2 * h * w * cin * 2                      # x block (double-buffered, bf16)
        + 2 * ho * wo * cout * odt               # out block (double-buffered)
        + hp_h * hp_w * p * 2                    # padded conv1 scratch (bf16)
        + h * w * p * (4 + 2)                    # conv1 f32 acc + bf16 copy
        + ho * wo * (3 * p * 2 + p * 4 + p * 2)  # ky-patches + conv2 acc + h2
        + ho * wo * cout * 4                     # conv3 / residual f32 accumulator
        + (2 * ho * wo * cin * 2 if has_xs else 0)    # xs block
        + (hp_h * hp_w * p * 2 if stride > 1 else 0)  # polyphase planes
    )
    tb = _pick_batch_tile(n, per_img, tile_budget)

    b4 = lambda i: (i, 0, 0, 0)
    full = lambda i: (0, 0)

    in_specs = [pl.BlockSpec((tb, h, w, cin), b4)]
    inputs = [x]
    if has_xs:
        xs = x[:, ::stride, ::stride, :]         # 1x1 stride-s conv == subsample + 1x1
        in_specs.append(pl.BlockSpec((tb, ho, wo, cin), b4))
        inputs.append(xs)
    for name in ("w1", "b1", "w2", "b2", "w3", "b3"):
        in_specs.append(pl.BlockSpec(kp[name].shape, full))
        inputs.append(kp[name])
    if project:
        for name in ("ws", "bs"):
            in_specs.append(pl.BlockSpec(kp[name].shape, full))
            inputs.append(kp[name])

    kernel = functools.partial(_bottleneck_kernel, ho=ho, wo=wo, stride=stride,
                               project=project, has_xs=has_xs)
    return pl.pallas_call(
        kernel,
        out_shape=jax.ShapeDtypeStruct((n, ho, wo, cout), out_dtype),
        grid=(n // tb,),
        in_specs=in_specs,
        out_specs=pl.BlockSpec((tb, ho, wo, cout), b4),
        scratch_shapes=[pltpu.VMEM((tb, hp_h, hp_w, p), jnp.bfloat16)],
        compiler_params=pltpu.CompilerParams(
            dimension_semantics=("parallel",),
            vmem_limit_bytes=vmem_limit),
    )(*inputs)


# ----------------------------------------------------------------------------
# Parameters / BN folding
# ----------------------------------------------------------------------------
def fold_bn(gamma, beta, mean, var):
    scale = gamma / jnp.sqrt(var + EPS)
    return scale, beta - mean * scale


def prepare_kernel_params(p):
    """Fold BN scale into the conv weights (bf16) and keep f32 biases."""
    bf16 = jnp.bfloat16
    kp = {}
    kp["w1"] = (p["w1"] * p["s1"][None, :]).astype(bf16)              # (Cin, P)
    kp["b1"] = p["b1"].reshape(1, -1).astype(jnp.float32)
    w2 = p["w2"] * p["s2"][None, None, None, :]                       # (3,3,P,P) HWIO
    kp["w2"] = w2.reshape(-1, w2.shape[-1]).astype(bf16)              # (9*P, P), tap-major
    kp["b2"] = p["b2"].reshape(1, -1).astype(jnp.float32)
    kp["w3"] = (p["w3"] * p["s3"][None, :]).astype(bf16)              # (P, 4P)
    kp["b3"] = p["b3"].reshape(1, -1).astype(jnp.float32)
    kp["ws"] = (p["ws"] * p["ss"][None, :]).astype(bf16)              # (Cin, 4P)
    kp["bs"] = p["bs"].reshape(1, -1).astype(jnp.float32)
    return kp


def init_bottleneck_params(key, in_planes, planes):
    expansion = 4
    out_planes = expansion * planes
    ks = jax.random.split(key, 8)

    def bn_params(k, c):
        k1, k2, k3, k4 = jax.random.split(k, 4)
        gamma = 1.0 + 0.1 * jax.random.normal(k1, (c,), jnp.float32)
        beta = 0.1 * jax.random.normal(k2, (c,), jnp.float32)
        mean = 0.1 * jax.random.normal(k3, (c,), jnp.float32)
        var = jax.random.uniform(k4, (c,), jnp.float32, 0.5, 1.5)
        return fold_bn(gamma, beta, mean, var)

    p = {}
    p["w1"] = 0.2 * jax.random.normal(ks[0], (in_planes, planes), jnp.float32)
    p["s1"], p["b1"] = bn_params(ks[1], planes)
    p["w2"] = 0.2 * jax.random.normal(ks[2], (3, 3, planes, planes), jnp.float32)
    p["s2"], p["b2"] = bn_params(ks[3], planes)
    p["w3"] = 0.2 * jax.random.normal(ks[4], (planes, out_planes), jnp.float32)
    p["s3"], p["b3"] = bn_params(ks[5], out_planes)
    p["ws"] = 0.2 * jax.random.normal(ks[6], (in_planes, out_planes), jnp.float32)
    p["ss"], p["bs"] = bn_params(ks[7], out_planes)
    return p


# ----------------------------------------------------------------------------
# Bottleneck forward (Pallas-backed)
# ----------------------------------------------------------------------------
def bottleneck_forward_nhwc(x_nhwc, params, *, in_planes, planes, stride=1,
                            out_dtype=jnp.bfloat16):
    """NHWC entry point (use this when chaining blocks; output is bf16 NHWC)."""
    out_planes = 4 * planes
    project = (stride != 1) or (in_planes != out_planes)
    kp = prepare_kernel_params(params)
    return fused_bottleneck(x_nhwc, kp, stride=stride, project=project,
                            out_dtype=out_dtype)


def bottleneck_forward(x_nchw, params, *, in_planes, planes, stride=1):
    """NCHW interface matching the PyTorch module (transposes at the boundary)."""
    x = jnp.transpose(x_nchw, (0, 2, 3, 1))                 # NCHW -> NHWC
    out = bottleneck_forward_nhwc(x, params, in_planes=in_planes,
                                  planes=planes, stride=stride)
    return jnp.transpose(out, (0, 3, 1, 2)).astype(jnp.float32)   # NHWC -> NCHW


# ----------------------------------------------------------------------------
# Pure-JAX reference (sanity check)
# ----------------------------------------------------------------------------
def bottleneck_ref(x_nchw, p, *, in_planes, planes, stride=1):
    out_planes = 4 * planes
    x = jnp.transpose(x_nchw, (0, 2, 3, 1))
    dn = ("NHWC", "HWIO", "NHWC")

    def conv1x1(h, w, s):
        w4 = w.reshape(1, 1, *w.shape)
        return jax.lax.conv_general_dilated(h, w4, (s, s), [(0, 0), (0, 0)],
                                            dimension_numbers=dn)

    def conv3x3(h, w, s):
        return jax.lax.conv_general_dilated(h, w, (s, s), [(1, 1), (1, 1)],
                                            dimension_numbers=dn)

    h = jax.nn.relu(conv1x1(x, p["w1"], 1) * p["s1"] + p["b1"])
    h = jax.nn.relu(conv3x3(h, p["w2"], stride) * p["s2"] + p["b2"])
    h = conv1x1(h, p["w3"], 1) * p["s3"] + p["b3"]
    if stride != 1 or in_planes != out_planes:
        sc = conv1x1(x, p["ws"], stride) * p["ss"] + p["bs"]
    else:
        sc = x
    return jnp.transpose(jax.nn.relu(h + sc), (0, 3, 1, 2))


if __name__ == "__main__":
    key = jax.random.PRNGKey(0)
    kx, kparams = jax.random.split(key)

    N, in_planes, H, W = 2, 4, 16, 16
    planes, stride = 4, 1  # projection shortcut triggered (in_planes != 4*planes)

    x = jax.random.normal(kx, (N, in_planes, H, W), jnp.float32)
    params = init_bottleneck_params(kparams, in_planes, planes)

    fwd = jax.jit(functools.partial(bottleneck_forward, in_planes=in_planes,
                                    planes=planes, stride=stride))
    out = jax.block_until_ready(fwd(x, params))

    assert out.shape == (N, 4 * planes, H, W), out.shape
    ref = bottleneck_ref(x, params, in_planes=in_planes, planes=planes,
                         stride=stride)
    # bf16 matmul inputs + bf16 output store (f32 accumulation / epilogue) ->
    # slightly looser tolerance than a pure-f32 path would need.
    np.testing.assert_allclose(np.asarray(out, dtype=np.float32),
                               np.asarray(ref, dtype=np.float32),
                               atol=4e-2, rtol=4e-2)
    print("KERNEL_OK")
</pallas_src>

<mosaic_0001>
module attributes {stable_mosaic.version = 11 : i64} {
  func.func @_bottleneck_kernel(%arg0: i32, %arg1: memref<1x16x16x4xbf16, #tpu.memory_space<vmem>>, %arg2: memref<4x4xbf16, #tpu.memory_space<vmem>>, %arg3: memref<1x4xf32, #tpu.memory_space<vmem>>, %arg4: memref<36x4xbf16, #tpu.memory_space<vmem>>, %arg5: memref<1x4xf32, #tpu.memory_space<vmem>>, %arg6: memref<4x16xbf16, #tpu.memory_space<vmem>>, %arg7: memref<1x16xf32, #tpu.memory_space<vmem>>, %arg8: memref<4x16xbf16, #tpu.memory_space<vmem>>, %arg9: memref<1x16xf32, #tpu.memory_space<vmem>>, %arg10: memref<1x16x16x16xbf16, #tpu.memory_space<vmem>>, %arg11: memref<1x18x18x4xbf16, #tpu.memory_space<vmem>>) attributes {dimension_semantics = [#tpu.dimension_semantics<parallel>], iteration_bounds = array<i64: 2>, scalar_prefetch = 0 : i64, scratch_operands = 1 : i64, tpu.core_type = #tpu.core_type<tc>, window_params = [{transform_indices = @transform_0, window_bounds = array<i64: 1, 16, 16, 4>}, {pipeline_mode = #tpu.pipeline_mode<synchronous>, transform_indices = @transform_1, window_bounds = array<i64: 4, 4>}, {pipeline_mode = #tpu.pipeline_mode<synchronous>, transform_indices = @transform_2, window_bounds = array<i64: 1, 4>}, {pipeline_mode = #tpu.pipeline_mode<synchronous>, transform_indices = @transform_3, window_bounds = array<i64: 36, 4>}, {pipeline_mode = #tpu.pipeline_mode<synchronous>, transform_indices = @transform_4, window_bounds = array<i64: 1, 4>}, {pipeline_mode = #tpu.pipeline_mode<synchronous>, transform_indices = @transform_5, window_bounds = array<i64: 4, 16>}, {pipeline_mode = #tpu.pipeline_mode<synchronous>, transform_indices = @transform_6, window_bounds = array<i64: 1, 16>}, {pipeline_mode = #tpu.pipeline_mode<synchronous>, transform_indices = @transform_7, window_bounds = array<i64: 4, 16>}, {pipeline_mode = #tpu.pipeline_mode<synchronous>, transform_indices = @transform_8, window_bounds = array<i64: 1, 16>}, {transform_indices = @transform_9, window_bounds = array<i64: 1, 16, 16, 16>}]} {
    %c0 = arith.constant 0 : index
    %c0_0 = arith.constant 0 : index
    %c0_1 = arith.constant 0 : index
    %c0_2 = arith.constant 0 : index
    %0 = vector.load %arg1[%c0, %c0_0, %c0_1, %c0_2] : memref<1x16x16x4xbf16, #tpu.memory_space<vmem>>, vector<1x16x16x4xbf16>
    %1 = vector.shape_cast %0 : vector<1x16x16x4xbf16> to vector<256x4xbf16>
    %c0_3 = arith.constant 0 : index
    %c0_4 = arith.constant 0 : index
    %2 = vector.load %arg2[%c0_3, %c0_4] : memref<4x4xbf16, #tpu.memory_space<vmem>>, vector<4x4xbf16>
    %cst = arith.constant dense<0.000000e+00> : vector<256x4xf32>
    %3 = tpu.matmul %1, %2, %cst {dimension_numbers = #tpu.dot_dimension_numbers<[1], [0], [0], [1], [0, 0, 1, 1], [], []>} : vector<256x4xbf16>, vector<4x4xbf16>, vector<256x4xf32> -> vector<256x4xf32>
    %c0_5 = arith.constant 0 : index
    %c0_6 = arith.constant 0 : index
    %4 = vector.load %arg3[%c0_5, %c0_6] : memref<1x4xf32, #tpu.memory_space<vmem>>, vector<1x4xf32>
    %5 = vector.broadcast %4 : vector<1x4xf32> to vector<256x4xf32>
    %6 = arith.addf %3, %5 : vector<256x4xf32>
    %cst_7 = arith.constant 0.000000e+00 : f32
    %7 = vector.broadcast %cst_7 : f32 to vector<256x4xf32>
    %8 = arith.maximumf %6, %7 : vector<256x4xf32>
    %9 = arith.truncf %8 : vector<256x4xf32> to vector<256x4xbf16>
    %cst_8 = arith.constant 0.000000e+00 : bf16
    %10 = vector.broadcast %cst_8 : bf16 to vector<1x18x18x4xbf16>
    %c0_9 = arith.constant 0 : index
    %c0_10 = arith.constant 0 : index
    %c0_11 = arith.constant 0 : index
    %c0_12 = arith.constant 0 : index
    %11 = vector.load %arg11[%c0_9, %c0_10, %c0_11, %c0_12] : memref<1x18x18x4xbf16, #tpu.memory_space<vmem>>, vector<1x18x18x4xbf16>
    tpu.vector_store %arg11[%c0_9, %c0_10, %c0_11, %c0_12], %10 {strides = array<i32>} : memref<1x18x18x4xbf16, #tpu.memory_space<vmem>>, vector<1x18x18x4xbf16>,
    %12 = vector.shape_cast %9 : vector<256x4xbf16> to vector<1x16x16x4xbf16>
    %c0_13 = arith.constant 0 : index
    %c1 = arith.constant 1 : index
    %c1_14 = arith.constant 1 : index
    %c0_15 = arith.constant 0 : index
    %13 = vector.load %arg11[%c0_13, %c1, %c1_14, %c0_15] : memref<1x18x18x4xbf16, #tpu.memory_space<vmem>>, vector<1x16x16x4xbf16>
    tpu.vector_store %arg11[%c0_13, %c1, %c1_14, %c0_15], %12 {strides = array<i32>} : memref<1x18x18x4xbf16, #tpu.memory_space<vmem>>, vector<1x16x16x4xbf16>,
    %c0_16 = arith.constant 0 : index
    %c0_17 = arith.constant 0 : index
    %c0_18 = arith.constant 0 : index
    %c0_19 = arith.constant 0 : index
    %14 = vector.load %arg11[%c0_16, %c0_17, %c0_18, %c0_19] : memref<1x18x18x4xbf16, #tpu.memory_space<vmem>>, vector<1x18x18x4xbf16>
    %15 = vector.extract_strided_slice %14 {offsets = [0, 0, 0, 0], sizes = [1, 16, 16, 4], strides = [1, 1, 1, 1]} : vector<1x18x18x4xbf16> to vector<1x16x16x4xbf16>
    %16 = vector.shape_cast %15 : vector<1x16x16x4xbf16> to vector<256x4xbf16>
    %17 = vector.extract_strided_slice %14 {offsets = [0, 0, 1, 0], sizes = [1, 16, 16, 4], strides = [1, 1, 1, 1]} : vector<1x18x18x4xbf16> to vector<1x16x16x4xbf16>
    %18 = vector.shape_cast %17 : vector<1x16x16x4xbf16> to vector<256x4xbf16>
    %19 = vector.extract_strided_slice %14 {offsets = [0, 0, 2, 0], sizes = [1, 16, 16, 4], strides = [1, 1, 1, 1]} : vector<1x18x18x4xbf16> to vector<1x16x16x4xbf16>
    %20 = vector.shape_cast %19 : vector<1x16x16x4xbf16> to vector<256x4xbf16>
    %21 = tpu.concatenate %16, %18, %20 in 1 : vector<256x4xbf16>, vector<256x4xbf16>, vector<256x4xbf16> -> vector<256x12xbf16>
    %c0_20 = arith.constant 0 : index
    %c0_21 = arith.constant 0 : index
    %22 = vector.load %arg4[%c0_20, %c0_21] : memref<36x4xbf16, #tpu.memory_space<vmem>>, vector<12x4xbf16>
    %cst_22 = arith.constant dense<0.000000e+00> : vector<256x4xf32>
    %23 = tpu.matmul %21, %22, %cst_22 {dimension_numbers = #tpu.dot_dimension_numbers<[1], [0], [0], [1], [0, 0, 1, 1], [], []>} : vector<256x12xbf16>, vector<12x4xbf16>, vector<256x4xf32> -> vector<256x4xf32>
    %24 = vector.extract_strided_slice %14 {offsets = [0, 1, 0, 0], sizes = [1, 16, 16, 4], strides = [1, 1, 1, 1]} : vector<1x18x18x4xbf16> to vector<1x16x16x4xbf16>
    %25 = vector.shape_cast %24 : vector<1x16x16x4xbf16> to vector<256x4xbf16>
    %26 = vector.extract_strided_slice %14 {offsets = [0, 1, 1, 0], sizes = [1, 16, 16, 4], strides = [1, 1, 1, 1]} : vector<1x18x18x4xbf16> to vector<1x16x16x4xbf16>
    %27 = vector.shape_cast %26 : vector<1x16x16x4xbf16> to vector<256x4xbf16>
    %28 = vector.extract_strided_slice %14 {offsets = [0, 1, 2, 0], sizes = [1, 16, 16, 4], strides = [1, 1, 1, 1]} : vector<1x18x18x4xbf16> to vector<1x16x16x4xbf16>
    %29 = vector.shape_cast %28 : vector<1x16x16x4xbf16> to vector<256x4xbf16>
    %30 = tpu.concatenate %25, %27, %29 in 1 : vector<256x4xbf16>, vector<256x4xbf16>, vector<256x4xbf16> -> vector<256x12xbf16>
    %c12 = arith.constant 12 : index
    %c0_23 = arith.constant 0 : index
    %31 = vector.load %arg4[%c12, %c0_23] : memref<36x4xbf16, #tpu.memory_space<vmem>>, vector<12x4xbf16>
    %cst_24 = arith.constant dense<0.000000e+00> : vector<256x4xf32>
    %32 = tpu.matmul %30, %31, %cst_24 {dimension_numbers = #tpu.dot_dimension_numbers<[1], [0], [0], [1], [0, 0, 1, 1], [], []>} : vector<256x12xbf16>, vector<12x4xbf16>, vector<256x4xf32> -> vector<256x4xf32>
    %33 = arith.addf %23, %32 : vector<256x4xf32>
    %34 = vector.extract_strided_slice %14 {offsets = [0, 2, 0, 0], sizes = [1, 16, 16, 4], strides = [1, 1, 1, 1]} : vector<1x18x18x4xbf16> to vector<1x16x16x4xbf16>
    %35 = vector.shape_cast %34 : vector<1x16x16x4xbf16> to vector<256x4xbf16>
    %36 = vector.extract_strided_slice %14 {offsets = [0, 2, 1, 0], sizes = [1, 16, 16, 4], strides = [1, 1, 1, 1]} : vector<1x18x18x4xbf16> to vector<1x16x16x4xbf16>
    %37 = vector.shape_cast %36 : vector<1x16x16x4xbf16> to vector<256x4xbf16>
    %38 = vector.extract_strided_slice %14 {offsets = [0, 2, 2, 0], sizes = [1, 16, 16, 4], strides = [1, 1, 1, 1]} : vector<1x18x18x4xbf16> to vector<1x16x16x4xbf16>
    %39 = vector.shape_cast %38 : vector<1x16x16x4xbf16> to vector<256x4xbf16>
    %40 = tpu.concatenate %35, %37, %39 in 1 : vector<256x4xbf16>, vector<256x4xbf16>, vector<256x4xbf16> -> vector<256x12xbf16>
    %c24 = arith.constant 24 : index
    %c0_25 = arith.constant 0 : index
    %41 = vector.load %arg4[%c24, %c0_25] : memref<36x4xbf16, #tpu.memory_space<vmem>>, vector<12x4xbf16>
    %cst_26 = arith.constant dense<0.000000e+00> : vector<256x4xf32>
    %42 = tpu.matmul %40, %41, %cst_26 {dimension_numbers = #tpu.dot_dimension_numbers<[1], [0], [0], [1], [0, 0, 1, 1], [], []>} : vector<256x12xbf16>, vector<12x4xbf16>, vector<256x4xf32> -> vector<256x4xf32>
    %43 = arith.addf %33, %42 : vector<256x4xf32>
    %c0_27 = arith.constant 0 : index
    %c0_28 = arith.constant 0 : index
    %44 = vector.load %arg5[%c0_27, %c0_28] : memref<1x4xf32, #tpu.memory_space<vmem>>, vector<1x4xf32>
    %45 = vector.broadcast %44 : vector<1x4xf32> to vector<256x4xf32>
    %46 = arith.addf %43, %45 : vector<256x4xf32>
    %cst_29 = arith.constant 0.000000e+00 : f32
    %47 = vector.broadcast %cst_29 : f32 to vector<256x4xf32>
    %48 = arith.maximumf %46, %47 : vector<256x4xf32>
    %49 = arith.truncf %48 : vector<256x4xf32> to vector<256x4xbf16>
    %c0_30 = arith.constant 0 : index
    %c0_31 = arith.constant 0 : index
    %50 = vector.load %arg6[%c0_30, %c0_31] : memref<4x16xbf16, #tpu.memory_space<vmem>>, vector<4x16xbf16>
    %cst_32 = arith.constant dense<0.000000e+00> : vector<256x16xf32>
    %51 = tpu.matmul %49, %50, %cst_32 {dimension_numbers = #tpu.dot_dimension_numbers<[1], [0], [0], [1], [0, 0, 1, 1], [], []>} : vector<256x4xbf16>, vector<4x16xbf16>, vector<256x16xf32> -> vector<256x16xf32>
    %c0_33 = arith.constant 0 : index
    %c0_34 = arith.constant 0 : index
    %52 = vector.load %arg7[%c0_33, %c0_34] : memref<1x16xf32, #tpu.memory_space<vmem>>, vector<1x16xf32>
    %53 = vector.broadcast %52 : vector<1x16xf32> to vector<256x16xf32>
    %54 = arith.addf %51, %53 : vector<256x16xf32>
    %55 = vector.shape_cast %0 : vector<1x16x16x4xbf16> to vector<256x4xbf16>
    %c0_35 = arith.constant 0 : index
    %c0_36 = arith.constant 0 : index
    %56 = vector.load %arg8[%c0_35, %c0_36] : memref<4x16xbf16, #tpu.memory_space<vmem>>, vector<4x16xbf16>
    %cst_37 = arith.constant dense<0.000000e+00> : vector<256x16xf32>
    %57 = tpu.matmul %55, %56, %cst_37 {dimension_numbers = #tpu.dot_dimension_numbers<[1], [0], [0], [1], [0, 0, 1, 1], [], []>} : vector<256x4xbf16>, vector<4x16xbf16>, vector<256x16xf32> -> vector<256x16xf32>
    %58 = arith.addf %54, %57 : vector<256x16xf32>
    %c0_38 = arith.constant 0 : index
    %c0_39 = arith.constant 0 : index
    %59 = vector.load %arg9[%c0_38, %c0_39] : memref<1x16xf32, #tpu.memory_space<vmem>>, vector<1x16xf32>
    %60 = vector.broadcast %59 : vector<1x16xf32> to vector<256x16xf32>
    %61 = arith.addf %58, %60 : vector<256x16xf32>
    %cst_40 = arith.constant 0.000000e+00 : f32
    %62 = vector.broadcast %cst_40 : f32 to vector<256x16xf32>
    %63 = arith.maximumf %61, %62 : vector<256x16xf32>
    %64 = vector.shape_cast %63 : vector<256x16xf32> to vector<1x16x16x16xf32>
    %65 = arith.truncf %64 : vector<1x16x16x16xf32> to vector<1x16x16x16xbf16>
    %c0_41 = arith.constant 0 : index
    %c0_42 = arith.constant 0 : index
    %c0_43 = arith.constant 0 : index
    %c0_44 = arith.constant 0 : index
    %66 = vector.load %arg10[%c0_41, %c0_42, %c0_43, %c0_44] : memref<1x16x16x16xbf16, #tpu.memory_space<vmem>>, vector<1x16x16x16xbf16>
    tpu.vector_store %arg10[%c0_41, %c0_42, %c0_43, %c0_44], %65 {strides = array<i32>} : memref<1x16x16x16xbf16, #tpu.memory_space<vmem>>, vector<1x16x16x16xbf16>,
    return
  }
  func.func @transform_0(%arg0: i32) -> (i32, i32, i32, i32) {
    %c0_i32 = arith.constant 0 : i32
    %c0_i32_0 = arith.constant 0 : i32
    %c0_i32_1 = arith.constant 0 : i32
    %c0_i32_2 = arith.constant 0 : i32
    return %arg0, %c0_i32, %c0_i32_0, %c0_i32_1 : i32, i32, i32, i32
  }
  func.func @transform_1(%arg0: i32) -> (i32, i32) {
    %c0_i32 = arith.constant 0 : i32
    %c0_i32_0 = arith.constant 0 : i32
    %c0_i32_1 = arith.constant 0 : i32
    return %c0_i32, %c0_i32_0 : i32, i32
  }
  func.func @transform_2(%arg0: i32) -> (i32, i32) {
    %c0_i32 = arith.constant 0 : i32
    %c0_i32_0 = arith.constant 0 : i32
    %c0_i32_1 = arith.constant 0 : i32
    return %c0_i32, %c0_i32_0 : i32, i32
  }
  func.func @transform_3(%arg0: i32) -> (i32, i32) {
    %c0_i32 = arith.constant 0 : i32
    %c0_i32_0 = arith.constant 0 : i32
    %c0_i32_1 = arith.constant 0 : i32
    return %c0_i32, %c0_i32_0 : i32, i32
  }
  func.func @transform_4(%arg0: i32) -> (i32, i32) {
    %c0_i32 = arith.constant 0 : i32
    %c0_i32_0 = arith.constant 0 : i32
    %c0_i32_1 = arith.constant 0 : i32
    return %c0_i32, %c0_i32_0 : i32, i32
  }
  func.func @transform_5(%arg0: i32) -> (i32, i32) {
    %c0_i32 = arith.constant 0 : i32
    %c0_i32_0 = arith.constant 0 : i32
    %c0_i32_1 = arith.constant 0 : i32
    return %c0_i32, %c0_i32_0 : i32, i32
  }
  func.func @transform_6(%arg0: i32) -> (i32, i32) {
    %c0_i32 = arith.constant 0 : i32
    %c0_i32_0 = arith.constant 0 : i32
    %c0_i32_1 = arith.constant 0 : i32
    return %c0_i32, %c0_i32_0 : i32, i32
  }
  func.func @transform_7(%arg0: i32) -> (i32, i32) {
    %c0_i32 = arith.constant 0 : i32
    %c0_i32_0 = arith.constant 0 : i32
    %c0_i32_1 = arith.constant 0 : i32
    return %c0_i32, %c0_i32_0 : i32, i32
  }
  func.func @transform_8(%arg0: i32) -> (i32, i32) {
    %c0_i32 = arith.constant 0 : i32
    %c0_i32_0 = arith.constant 0 : i32
    %c0_i32_1 = arith.constant 0 : i32
    return %c0_i32, %c0_i32_0 : i32, i32
  }
  func.func @transform_9(%arg0: i32) -> (i32, i32, i32, i32) {
    %c0_i32 = arith.constant 0 : i32
    %c0_i32_0 = arith.constant 0 : i32
    %c0_i32_1 = arith.constant 0 : i32
    %c0_i32_2 = arith.constant 0 : i32
    return %arg0, %c0_i32, %c0_i32_0, %c0_i32_1 : i32, i32, i32, i32
  }
}

</mosaic_0001>

<bundles_post_ra>
// kernel: bottleneck_forward.1
= control target key start
LH: loop header
LB: loop body
LE: loop exit
PB: predicated region body
PF: predicated region fallthrough
CT: control target
= control target key end

     0   :  { %s4567_s30 = smov 0   ;;  %s5731_s0 = inlined_call_operand.vmem [shape: bf16[2,16,16,4], index: 0, kind: input, shape index: {}]   ;;  %s5732_s1 = inlined_call_operand.vmem [shape: bf16[4,4], index: 1, kind: input, shape index: {}]   ;;  %s5733_s2 = inlined_call_operand.vmem [shape: f32[1,4], index: 2, kind: input, shape index: {}]   ;;  %s5734_s3 = inlined_call_operand.vmem [shape: bf16[36,4], index: 3, kind: input, shape index: {}]   ;;  %s5735_s4 = inlined_call_operand.vmem [shape: f32[1,4], index: 4, kind: input, shape index: {}]   ;;  %s5736_s5 = inlined_call_operand.vmem [shape: bf16[4,16], index: 5, kind: input, shape index: {}]   ;;  %s5737_s6 = inlined_call_operand.vmem [shape: f32[1,16], index: 6, kind: input, shape index: {}]   ;;  %s5738_s7 = inlined_call_operand.vmem [shape: bf16[4,16], index: 7, kind: input, shape index: {}]   ;;  %s5739_s8 = inlined_call_operand.vmem [shape: f32[1,16], index: 8, kind: input, shape index: {}]   ;;  %s5740_s9 = inlined_call_operand.vmem [shape: bf16[2,16,16,16], index: 9, kind: output, shape index: {}]  }
   0x1 LB: > { %s3665_s10 = sadd.s32 4294967295, %s4512_s30   ;;  %p3669_p0 = scmp.ge.s32.totalorder %s4512_s30, 1  ;;  %s4512_s30 = sphi %s4567_s30, %s19_s30  }
   0x2   : > { %p287_p1 = scmp.lt.s32.totalorder %s4512_s30, 3 }
   0x4   : > { %p288_p2 = pnand %p3669_p0, %p287_p1 }
   0x5   : > { %v366_v0 = vld [vmem:[%s5732_s1] sm:$0x3] (!%p288_p2)  ;;  %vm503_vm0 = vcmask (!%p288_p2), 1041408   ;;  %p323_p3 = scmp.lt.s32.totalorder (!%p288_p2), %s3665_s10, 1  ;;  %vm454_vm1 = vcmask (!%p288_p2), 31744   ;;  %vm716_vm2 = vcmask (!%p288_p2), 27648  }
   0x6   : > { %291 = sbr.rel (%p288_p2) target bundleno = 1169 (0x491), region = 56  ;;  %4431 = vmatprep.subr.msk.bf16.mxu0 (!%p288_p2), %vm503_vm0, %v366_v0  ;;  %v505_v1 = vsel (!%p288_p2), %vm503_vm0, %v366_v0, 0  ;;  %v4514_v18 = vmov (!%p288_p2), 0   ;;  %vm719_vm3 = vcmask (!%p288_p2), 24576   ;;  %v4679_v19 = vld [vmem:[%s5733_s2] ss:$0 sm:$0xff] (!%p288_p2) }
   0x7   : > { %4100 = vmatpush3.bf16.msra.mxu0 (!%p288_p2), %v505_v1  ;;  %724 = vst.msk [vmem:[#allocation2 + $0x18] sm:$0xf] (!%p288_p2), %vm716_vm2, %v4514_v18  ;;  %717 = vst.msk [vmem:[#allocation2] sm:$0xf] (!%p288_p2), %vm716_vm2, %v4514_v18  ;;  %vm1177_vm4 = vsmask.f32 (!%p288_p2), 7938 }
   0x8   : > { %718 = vst.msk [vmem:[#allocation2 + $0x4] sm:$0xf] (!%p288_p2), %vm716_vm2, %v4514_v18  ;;  %721 = vst.msk [vmem:[#allocation2 + $0xc] sm:$0xf] (!%p288_p2), %vm716_vm2, %v4514_v18  ;;  %vm852_vm5 = vsmask.f32 (!%p288_p2), 256 }
   0x9   : > { %722 = vst.msk [vmem:[#allocation2 + $0x10] sm:$0xf] (!%p288_p2), %vm716_vm2, %v4514_v18  ;;  %725 = vst.msk [vmem:[#allocation2 + $0x1c] sm:$0xf] (!%p288_p2), %vm716_vm2, %v4514_v18  ;;  %vm853_vm6 = vsmask.f32 (!%p288_p2), 4368 }
   0xa   : > { %727 = vst.msk [vmem:[#allocation2 + $0x24] sm:$0xf] (!%p288_p2), %vm716_vm2, %v4514_v18  ;;  %728 = vst.msk [vmem:[#allocation2 + $0x28] sm:$0xf] (!%p288_p2), %vm716_vm2, %v4514_v18  ;;  %vm1782_vm10 = vcmask (!%p288_p2), 1042432   ;;  %vm1783_vm11 = vcmask (!%p288_p2), 1046532  }
   0xb   : > { %730 = vst.msk [vmem:[#allocation2 + $0x30] sm:$0xf] (!%p288_p2), %vm716_vm2, %v4514_v18  ;;  %731 = vst.msk [vmem:[#allocation2 + $0x34] sm:$0xf] (!%p288_p2), %vm716_vm2, %v4514_v18  ;;  %vm1347_vm13 = vsmask.f32 (!%p288_p2), 3328 }
   0xc   : > { %733 = vst.msk [vmem:[#allocation2 + $0x3c] sm:$0xf] (!%p288_p2), %vm716_vm2, %v4514_v18  ;;  %734 = vst.msk [vmem:[#allocation2 + $0x40] sm:$0xf] (!%p288_p2), %vm716_vm2, %v4514_v18  ;;  %vm1348_vm14 = vsmask.f32 (!%p288_p2), 7440 }
   0xd   : > { %s5752_s10 = smov (!%p323_p3, %s3665_s10), 1  ;;  %736 = vst.msk [vmem:[#allocation2 + $0x48] sm:$0xf] %vm716_vm2, %v4514_v18  ;;  %737 = vst.msk [vmem:[#allocation2 + $0x4c] sm:$0xf] %vm716_vm2, %v4514_v18  ;;  %s4515_s19 = smov 8  }
   0xe   : > { %s3931_s13 = sshll.u32 %s5752_s10, 7  ;;  %739 = vst.msk [vmem:[#allocation2 + $0x54] sm:$0xf] %vm716_vm2, %v4514_v18  ;;  %740 = vst.msk [vmem:[#allocation2 + $0x58] sm:$0xf] %vm716_vm2, %v4514_v18  ;;  %s4516_s20 = smov 4  }
   0xf   : > { %s4588_s16 = scalar_lea.vmem %s5731_s0, %s3931_s13  ;;  %742 = vst.msk [vmem:[#allocation2 + $0x60] sm:$0xf] %vm716_vm2, %v4514_v18  ;;  %743 = vst.msk [vmem:[#allocation2 + $0x64] sm:$0xf] %vm716_vm2, %v4514_v18  ;;  %v1188_v47 = vld [vmem:[#allocation2 + $0x18] sm:$0xf]  ;;  %s5605_s23 = scalar_lea.vmem %s5740_s9, %s3931_s13 }
  0x10   : > { %v4448_v2 = vld [vmem:[%s4588_s16] sm:$0xff]   ;;  %v4449_v3 = vld [vmem:[%s4588_s16 + $0x8] sm:$0xff]   ;;  %v4450_v4 = vld [vmem:[%s4588_s16 + $0x10] sm:$0xff]   ;;  %745 = vst.msk [vmem:[#allocation2 + $0x6c] sm:$0xf] %vm716_vm2, %v4514_v18 }
  0x11   : > { %4101 = vmatprep.mubr.msk.bf16.mxu0 %vm454_vm1, %v4448_v2  ;;  %v4451_v5 = vld [vmem:[%s4588_s16 + $0x18] sm:$0xff]   ;;  %v4452_v6 = vld [vmem:[%s4588_s16 + $0x20] sm:$0xff]   ;;  %v4453_v7 = vld [vmem:[%s4588_s16 + $0x28] sm:$0xff]   ;;  %746 = vst.msk [vmem:[#allocation2 + $0x70] sm:$0xf] %vm716_vm2, %v4514_v18 }
  0x12   : > { %4102 = vmatmul.mubr.msk.bf16.vlgmr.msra.gmra.mrb[0].mxu0 %vm454_vm1, %v4449_v3  ;;  %v4454_v8 = vld [vmem:[%s4588_s16 + $0x30] sm:$0xff]   ;;  %v4455_v9 = vld [vmem:[%s4588_s16 + $0x38] sm:$0xff]   ;;  %v4456_v10 = vld [vmem:[%s4588_s16 + $0x40] sm:$0xff]   ;;  %748 = vst.msk [vmem:[#allocation2 + $0x78] sm:$0xf] %vm716_vm2, %v4514_v18 }
  0x13   : > { %4105 = vmatprep.mubr.msk.bf16.mxu0 %vm454_vm1, %v4450_v4  ;;  %v4457_v11 = vld [vmem:[%s4588_s16 + $0x48] sm:$0xff]   ;;  %v4458_v12 = vld [vmem:[%s4588_s16 + $0x50] sm:$0xff]   ;;  %v4459_v13 = vld [vmem:[%s4588_s16 + $0x58] sm:$0xff]   ;;  %749 = vst.msk [vmem:[#allocation2 + $0x7c] sm:$0xf] %vm716_vm2, %v4514_v18 }
  0x14   : > { %v4460_v14 = vld [vmem:[%s4588_s16 + $0x60] sm:$0xff]   ;;  %v4461_v15 = vld [vmem:[%s4588_s16 + $0x68] sm:$0xff]   ;;  %v4462_v16 = vld [vmem:[%s4588_s16 + $0x70] sm:$0xff]   ;;  %751 = vst.msk [vmem:[#allocation2 + $0x84] sm:$0xf] %vm716_vm2, %v4514_v18 }
  0x15   : > { %v4463_v17 = vld [vmem:[%s4588_s16 + $0x78] sm:$0xff]   ;;  %752 = vst.msk [vmem:[#allocation2 + $0x88] sm:$0xf] %vm716_vm2, %v4514_v18  ;;  %754 = vst.msk [vmem:[#allocation2 + $0x90] sm:$0xf] %vm716_vm2, %v4514_v18 }
  0x16   : > { %755 = vst.msk [vmem:[#allocation2 + $0x94] sm:$0xf] %vm716_vm2, %v4514_v18  ;;  %757 = vst.msk [vmem:[#allocation2 + $0x9c] sm:$0xf] %vm716_vm2, %v4514_v18  ;;  %v1179_v55 = vld [vmem:[#allocation2 + $0xc] sm:$0xf] }
  0x17   : > { %758 = vst.msk [vmem:[#allocation2 + $0xa0] sm:$0xf] %vm716_vm2, %v4514_v18  ;;  %760 = vst.msk [vmem:[#allocation2 + $0xa8] sm:$0xf] %vm716_vm2, %v4514_v18 }
  0x18   : > { %761 = vst.msk [vmem:[#allocation2 + $0xac] sm:$0xf] %vm716_vm2, %v4514_v18  ;;  %763 = vst.msk [vmem:[#allocation2 + $0xb4] sm:$0xf] %vm716_vm2, %v4514_v18 }
  0x19   : > { %764 = vst.msk [vmem:[#allocation2 + $0xb8] sm:$0xf] %vm716_vm2, %v4514_v18  ;;  %766 = vst.msk [vmem:[#allocation2 + $0xc0] sm:$0xf] %vm716_vm2, %v4514_v18 }
  0x1a   : > { %4106 = vmatmul.mubr.msk.bf16.gmra.mrb[4].mxu0 %vm454_vm1, %v4451_v5  ;;  %767 = vst.msk [vmem:[#allocation2 + $0xc4] sm:$0xf] %vm716_vm2, %v4514_v18  ;;  %769 = vst.msk [vmem:[#allocation2 + $0xcc] sm:$0xf] %vm716_vm2, %v4514_v18 }
  0x1b   : > { %4109 = vmatprep.mubr.msk.bf16.mxu0 %vm454_vm1, %v4452_v6  ;;  %770 = vst.msk [vmem:[#allocation2 + $0xd0] sm:$0xf] %vm716_vm2, %v4514_v18  ;;  %vm4688_vm7 = vmand %vm716_vm2, %vm1177_vm4  ;;  %vm2248_vm4 = vcmask 97280  }
  0x1c   : > { %726 = vst.msk [vmem:[#allocation2 + $0x20] sm:$0x1] %vm719_vm3, %v4514_v18  ;;  %720 = vst.msk [vmem:[#allocation2 + $0x8] sm:$0x1] %vm719_vm3, %v4514_v18 }
  0x1d   : > { %723 = vst.msk [vmem:[#allocation2 + $0x14] sm:$0x1] %vm719_vm3, %v4514_v18  ;;  %729 = vst.msk [vmem:[#allocation2 + $0x2c] sm:$0x1] %vm719_vm3, %v4514_v18 }
  0x1e   : > { %732 = vst.msk [vmem:[#allocation2 + $0x38] sm:$0x1] %vm719_vm3, %v4514_v18  ;;  %735 = vst.msk [vmem:[#allocation2 + $0x44] sm:$0x1] %vm719_vm3, %v4514_v18 }
  0x1f   : > { %738 = vst.msk [vmem:[#allocation2 + $0x50] sm:$0x1] %vm719_vm3, %v4514_v18  ;;  %741 = vst.msk [vmem:[#allocation2 + $0x5c] sm:$0x1] %vm719_vm3, %v4514_v18 }
  0x20   : > { %744 = vst.msk [vmem:[#allocation2 + $0x68] sm:$0x1] %vm719_vm3, %v4514_v18  ;;  %747 = vst.msk [vmem:[#allocation2 + $0x74] sm:$0x1] %vm719_vm3, %v4514_v18 }
  0x21   : > { %750 = vst.msk [vmem:[#allocation2 + $0x80] sm:$0x1] %vm719_vm3, %v4514_v18  ;;  %753 = vst.msk [vmem:[#allocation2 + $0x8c] sm:$0x1] %vm719_vm3, %v4514_v18 }
  0x22   : > { %4110 = vmatmul.mubr.msk.bf16.gmra.mrb[8].mxu0 %vm454_vm1, %v4453_v7  ;;  %756 = vst.msk [vmem:[#allocation2 + $0x98] sm:$0x1] %vm719_vm3, %v4514_v18  ;;  %759 = vst.msk [vmem:[#allocation2 + $0xa4] sm:$0x1] %vm719_vm3, %v4514_v18 }
  0x23   : > { %4113 = vmatprep.mubr.msk.bf16.mxu0 %vm454_vm1, %v4454_v8  ;;  %762 = vst.msk [vmem:[#allocation2 + $0xb0] sm:$0x1] %vm719_vm3, %v4514_v18  ;;  %765 = vst.msk [vmem:[#allocation2 + $0xbc] sm:$0x1] %vm719_vm3, %v4514_v18  ;;  %v1192_v63 = vld [vmem:[#allocation2 + $0x20] sm:$0x1] }
  0x24   : > { %768 = vst.msk [vmem:[#allocation2 + $0xc8] sm:$0x1] %vm719_vm3, %v4514_v18  ;;  %771 = vst.msk [vmem:[#allocation2 + $0xd4] sm:$0x1] %vm719_vm3, %v4514_v18  ;;  %v1185_v5 = vld [vmem:[#allocation2 + $0x14] sm:$0x1] }
  0x25   : > { %vm4695_vm8 = vmor %vm852_vm5, %vm853_vm6 }
  0x26   : > { %vm4701_vm9 = vmand %vm719_vm3, %vm852_vm5  ;;  %vm2153_vm3 = vcmask 64512  }
  0x27   : > { %vm4781_vm12 = vmor %vm1782_vm10, %vm1783_vm11 }
  0x28   : > { %vm4865_vm15 = vmor %vm1347_vm13, %vm1348_vm14 }
  0x2a   : > { %4114 = vmatmul.mubr.msk.bf16.gmra.mrb[12].mxu0 %vm454_vm1, %v4455_v9 }
  0x2b   : > { %4117 = vmatprep.mubr.msk.bf16.mxu0 %vm454_vm1, %v4456_v10 }
  0x32   : > { %4118 = vmatmul.mubr.msk.bf16.gmra.mrb[16].mxu0 %vm454_vm1, %v4457_v11 }
  0x33   : > { %4121 = vmatprep.mubr.msk.bf16.mxu0 %vm454_vm1, %v4458_v12 }
  0x3a   : > { %4122 = vmatmul.mubr.msk.bf16.gmra.mrb[20].mxu0 %vm454_vm1, %v4459_v13 }
  0x3b   : > { %4125 = vmatprep.mubr.msk.bf16.mxu0 %vm454_vm1, %v4460_v14 }
  0x42   : > { %4126 = vmatmul.mubr.msk.bf16.gmra.mrb[24].mxu0 %vm454_vm1, %v4461_v15 }
  0x43   : > { %4129 = vmatprep.mubr.msk.bf16.mxu0 %vm454_vm1, %v4462_v16 }
  0x4a   : > { %4130 = vmatmul.mubr.msk.bf16.gmra.mrb[28].mxu0 %vm454_vm1, %v4463_v17 }
  0xe5   : > { %v4103_v20 = vpop.f32.mrb[0].mxu0 }
  0xe6   : > { %v550_v21 = vadd.f32 %v4103_v20, %v4679_v19  ;;  %v541_v22 = vpop.f32.mrb[1].mxu0 }
  0xe7   : > { %v542_v23 = vadd.f32 %v4679_v19, %v541_v22  ;;  %v4104_v24 = vpop.f32.mrb[2].mxu0 }
  0xe8   : > { %v670_v25 = vmax.f32 %v550_v21, 0.0  ;;  %v553_v26 = vadd.f32 %v4104_v24, %v4679_v19  ;;  %v544_v27 = vpop.f32.mrb[3].mxu0 }
  0xe9   : > { %v668_v28 = vmax.f32 %v542_v23, 0.0  ;;  %v545_v29 = vadd.f32 %v4679_v19, %v544_v27 }
  0xea   : > { %v3935_v30 = vpack.c.bf16 %v670_v25, %v670_v25  ;;  %v671_v31 = vmax.f32 %v553_v26, 0.0  ;;  %v1202_v25 = vld [vmem:[#allocation2 + $0x30] sm:$0xf] }
  0xeb   : > { %v3933_v32 = vpack.c.bf16 %v668_v28, %v668_v28  ;;  %v669_v33 = vmax.f32 %v545_v29, 0.0 }
  0xec   : > { %v873_v34 = vshrl.u32 %v3935_v30, 16  ;;  %v3936_v35 = vpack.c.bf16 %v671_v31, %v671_v31  ;;  %v876_v36 = vshll.u32 %v3935_v30, 16 }
  0xed   : > { %v856_v37 = vshrl.u32 %v3933_v32, 16  ;;  %v859_v38 = vshll.u32 %v3933_v32, 16  ;;  %v3934_v39 = vpack.c.bf16 %v669_v33, %v669_v33  ;;  %v4107_v40 = vpop.f32.mrb[4].mxu0  ;;  %v1195_v32 = vld [vmem:[#allocation2 + $0x24] sm:$0xf] }
  0xee   : > { %v875_v41 = vrot.slane %v873_v34, 7  ;;  %v881_v42 = vshrl.u32 %v3936_v35, 16  ;;  %v884_v43 = vshll.u32 %v3936_v35, 16  ;;  %v566_v44 = vadd.f32 %v4107_v40, %v4679_v19  ;;  %v557_v45 = vpop.f32.mrb[5].mxu0 }
  0xef   : > { %v858_v48 = vrot.slane %v856_v37, 7  ;;  %v864_v49 = vshrl.u32 %v3934_v39, 16  ;;  %v867_v50 = vshll.u32 %v3934_v39, 16  ;;  %v558_v51 = vadd.f32 %v4679_v19, %v557_v45  ;;  %v4108_v52 = vpop.f32.mrb[6].mxu0 }
  0xf0   : > { %v878_v53 = vor.u32 %v876_v36, %v875_v41  ;;  %v879_v54 = vrot.slane %v875_v41, 4  ;;  %v883_v57 = vrot.slane %v881_v42, 7  ;;  %v674_v58 = vmax.f32 %v566_v44, 0.0  ;;  %v560_v59 = vpop.f32.mrb[7].mxu0 }
  0xf1   : > { %v861_v60 = vor.u32 %v859_v38, %v858_v48  ;;  %v862_v61 = vrot.slane %v858_v48, 4  ;;  %v866_v0 = vrot.slane %v864_v49, 7  ;;  %v672_v1 = vmax.f32 %v558_v51, 0.0 }
  0xf2   : > { %v1189_v2 = vsel %vm4688_vm7, %v878_v53, %v1188_v47  ;;  %v886_v3 = vor.u32 %v884_v43, %v883_v57  ;;  %v888_v4 = vrot.slane %v883_v57, 4  ;;  %v3939_v6 = vpack.c.bf16 %v674_v58, %v674_v58  ;;  %v1206_v53 = vld [vmem:[#allocation2 + $0x38] sm:$0x1] }
  0xf3   : > { %1190 = vst [vmem:[#allocation2 + $0x18] sm:$0xf] %v1189_v2  ;;  %v1180_v7 = vsel %vm4688_vm7, %v861_v60, %v1179_v55  ;;  %v869_v8 = vor.u32 %v867_v50, %v866_v0  ;;  %v871_v9 = vrot.slane %v866_v0, 4  ;;  %v3937_v10 = vpack.c.bf16 %v672_v1, %v672_v1 }
  0xf4   : > { %1181 = vst [vmem:[#allocation2 + $0xc] sm:$0xf] %v1180_v7  ;;  %v887_v11 = vsel %vm4695_vm8, %v879_v54, %v886_v3  ;;  %v1193_v12 = vsel %vm4701_vm9, %v888_v4, %v1192_v63  ;;  %v907_v13 = vshrl.u32 %v3939_v6, 16  ;;  %v910_v16 = vshll.u32 %v3939_v6, 16  ;;  %v1199_v54 = vld [vmem:[#allocation2 + $0x2c] sm:$0x1] }
  0xf5   : > { %1191 = vst.msk [vmem:[#allocation2 + $0x1c] sm:$0xf] %vm716_vm2, %v887_v11  ;;  %1194 = vst [vmem:[#allocation2 + $0x20] sm:$0x1] %v1193_v12  ;;  %v870_v14 = vsel %vm4695_vm8, %v862_v61, %v869_v8  ;;  %v1186_v15 = vsel %vm4701_vm9, %v871_v9, %v1185_v5  ;;  %v890_v17 = vshrl.u32 %v3937_v10, 16  ;;  %v4111_v18 = vpop.f32.mrb[8].mxu0  ;;  %v569_v21 = vadd.f32 %v4108_v52, %v4679_v19 }
  0xf6   : > { %1182 = vst.msk [vmem:[#allocation2 + $0x10] sm:$0xf] %vm716_vm2, %v870_v14  ;;  %1187 = vst [vmem:[#allocation2 + $0x14] sm:$0x1] %v1186_v15  ;;  %v4719_v20 = vrot.slane %v907_v13, 7  ;;  %v561_v22 = vadd.f32 %v4679_v19, %v560_v59  ;;  %v582_v23 = vadd.f32 %v4111_v18, %v4679_v19  ;;  %v573_v24 = vpop.f32.mrb[9].mxu0 }
  0xf7   : > { %v892_v26 = vrot.slane %v890_v17, 7  ;;  %v893_v27 = vshll.u32 %v3937_v10, 16  ;;  %v574_v28 = vadd.f32 %v4679_v19, %v573_v24  ;;  %v4112_v29 = vpop.f32.mrb[10].mxu0  ;;  %v675_v33 = vmax.f32 %v569_v21, 0.0  ;;  %v1216_v4 = vld [vmem:[#allocation2 + $0x48] sm:$0xf] }
  0xf8   : > { %v912_v30 = vor.u32 %v910_v16, %v4719_v20  ;;  %v913_v31 = vrot.slane %v4719_v20, 4  ;;  %v673_v34 = vmax.f32 %v561_v22, 0.0  ;;  %v576_v35 = vpop.f32.mrb[11].mxu0  ;;  %v678_v38 = vmax.f32 %v582_v23, 0.0  ;;  %v1209_v13 = vld [vmem:[#allocation2 + $0x3c] sm:$0xf] }
  0xf9   : > { %v895_v36 = vor.u32 %v893_v27, %v892_v26  ;;  %v896_v37 = vrot.slane %v892_v26, 4  ;;  %v676_v39 = vmax.f32 %v574_v28, 0.0  ;;  %v3940_v41 = vpack.c.bf16 %v675_v33, %v675_v33 }
  0xfa   : > { %v1203_v40 = vsel %vm4688_vm7, %v912_v30, %v1202_v25  ;;  %v3938_v42 = vpack.c.bf16 %v673_v34, %v673_v34  ;;  %v585_v43 = vadd.f32 %v4112_v29, %v4679_v19  ;;  %v3943_v45 = vpack.c.bf16 %v678_v38, %v678_v38  ;;  %v1220_v38 = vld [vmem:[#allocation2 + $0x50] sm:$0x1] }
  0xfb   : > { %1204 = vst [vmem:[#allocation2 + $0x30] sm:$0xf] %v1203_v40  ;;  %v1196_v44 = vsel %vm4688_vm7, %v895_v36, %v1195_v32  ;;  %v3941_v47 = vpack.c.bf16 %v676_v39, %v676_v39  ;;  %v577_v48 = vadd.f32 %v4679_v19, %v576_v35  ;;  %v915_v49 = vshrl.u32 %v3940_v41, 16  ;;  %v4759_v32 = vld [vmem:[#allocation2 + $0xc] sm:$0xf] }
  0xfc   : > { %1197 = vst [vmem:[#allocation2 + $0x24] sm:$0xf] %v1196_v44  ;;  %v918_v50 = vshll.u32 %v3940_v41, 16  ;;  %v898_v51 = vshrl.u32 %v3938_v42, 16  ;;  %v901_v52 = vshll.u32 %v3938_v42, 16  ;;  %v941_v55 = vshrl.u32 %v3943_v45, 16 }
  0xfd   : > { %v944_v57 = vshll.u32 %v3943_v45, 16  ;;  %v924_v58 = vshrl.u32 %v3941_v47, 16  ;;  %v927_v59 = vshll.u32 %v3941_v47, 16  ;;  %v4115_v60 = vpop.f32.mrb[12].mxu0  ;;  %v917_v61 = vrot.slane %v915_v49, 7 }
  0xfe   : > { %v900_v63 = vrot.slane %v898_v51, 7  ;;  %v679_v0 = vmax.f32 %v585_v43, 0.0  ;;  %v677_v1 = vmax.f32 %v577_v48, 0.0  ;;  %v589_v2 = vpop.f32.mrb[13].mxu0  ;;  %v4733_v3 = vrot.slane %v941_v55, 7 }
  0xff   : > { %v4735_v5 = vrot.slane %v924_v58, 7  ;;  %v598_v6 = vadd.f32 %v4115_v60, %v4679_v19  ;;  %v590_v7 = vadd.f32 %v4679_v19, %v589_v2  ;;  %v4116_v8 = vpop.f32.mrb[14].mxu0  ;;  %v920_v9 = vor.u32 %v918_v50, %v917_v61  ;;  %v1213_v47 = vld [vmem:[#allocation2 + $0x44] sm:$0x1] }
 0x100   : > { %v922_v10 = vrot.slane %v917_v61, 4  ;;  %v903_v11 = vor.u32 %v901_v52, %v900_v63  ;;  %v905_v12 = vrot.slane %v900_v63, 4  ;;  %v592_v14 = vpop.f32.mrb[15].mxu0  ;;  %v946_v15 = vor.u32 %v944_v57, %v4733_v3 }
 0x101   : > { %v947_v16 = vrot.slane %v4733_v3, 4  ;;  %v929_v17 = vor.u32 %v927_v59, %v4735_v5  ;;  %v930_v18 = vrot.slane %v4735_v5, 4  ;;  %v921_v20 = vsel %vm4695_vm8, %v913_v31, %v920_v9 }
 0x102   : > { %v1207_v21 = vsel %vm4701_vm9, %v922_v10, %v1206_v53  ;;  %v904_v22 = vsel %vm4695_vm8, %v896_v37, %v903_v11  ;;  %v1200_v23 = vsel %vm4701_vm9, %v905_v12, %v1199_v54  ;;  %1205 = vst.msk [vmem:[#allocation2 + $0x34] sm:$0xf] %vm716_vm2, %v921_v20  ;;  %v1217_v24 = vsel %vm4688_vm7, %v946_v15, %v1216_v4 }
 0x103   : > { %1208 = vst [vmem:[#allocation2 + $0x38] sm:$0x1] %v1207_v21  ;;  %1198 = vst.msk [vmem:[#allocation2 + $0x28] sm:$0xf] %vm716_vm2, %v904_v22  ;;  %v1210_v25 = vsel %vm4688_vm7, %v929_v17, %v1209_v13  ;;  %v3944_v26 = vpack.c.bf16 %v679_v0, %v679_v0  ;;  %v3942_v27 = vpack.c.bf16 %v677_v1, %v677_v1  ;;  %v682_v28 = vmax.f32 %v598_v6, 0.0 }
 0x104   : > { %1201 = vst [vmem:[#allocation2 + $0x2c] sm:$0x1] %v1200_v23  ;;  %1218 = vst [vmem:[#allocation2 + $0x48] sm:$0xf] %v1217_v24  ;;  %v680_v29 = vmax.f32 %v590_v7, 0.0  ;;  %v601_v30 = vadd.f32 %v4116_v8, %v4679_v19  ;;  %v593_v31 = vadd.f32 %v4679_v19, %v592_v14  ;;  %v3740_v49 = vrot.slane %v4759_v32, 9 }
 0x105   : > { %1211 = vst [vmem:[#allocation2 + $0x3c] sm:$0xf] %v1210_v25  ;;  %v949_v33 = vshrl.u32 %v3944_v26, 16  ;;  %v952_v34 = vshll.u32 %v3944_v26, 16  ;;  %v932_v35 = vshrl.u32 %v3942_v27, 16  ;;  %v935_v36 = vshll.u32 %v3942_v27, 16 }
 0x106   : > { %v4119_v37 = vpop.f32.mrb[16].mxu0  ;;  %v3947_v39 = vpack.c.bf16 %v682_v28, %v682_v28  ;;  %v3945_v40 = vpack.c.bf16 %v680_v29, %v680_v29  ;;  %v683_v41 = vmax.f32 %v601_v30, 0.0  ;;  %v681_v42 = vmax.f32 %v593_v31, 0.0  ;;  %v1230_v6 = vld [vmem:[#allocation2 + $0x60] sm:$0xf] }
 0x107   : > { %v605_v43 = vpop.f32.mrb[17].mxu0  ;;  %v951_v44 = vrot.slane %v949_v33, 7  ;;  %v934_v45 = vrot.slane %v932_v35, 7  ;;  %v614_v48 = vadd.f32 %v4119_v37, %v4679_v19  ;;  %v1223_v7 = vld [vmem:[#allocation2 + $0x54] sm:$0xf] }
 0x108   : > { %v4120_v50 = vpop.f32.mrb[18].mxu0  ;;  %v975_v51 = vshrl.u32 %v3947_v39, 16  ;;  %v978_v52 = vshll.u32 %v3947_v39, 16  ;;  %v958_v53 = vshrl.u32 %v3945_v40, 16  ;;  %v961_v54 = vshll.u32 %v3945_v40, 16 }
 0x109   : > { %v4763_v55 = vpop.f32.mrb[19].mxu0  ;;  %v954_v57 = vor.u32 %v952_v34, %v951_v44  ;;  %v956_v58 = vrot.slane %v951_v44, 4  ;;  %v937_v59 = vor.u32 %v935_v36, %v934_v45  ;;  %v939_v60 = vrot.slane %v934_v45, 4  ;;  %v4773_v8 = vld [vmem:[#allocation2 + $0x10] sm:$0xf] }
 0x10a   : > { %v977_v61 = vrot.slane %v975_v51, 7  ;;  %v960_v63 = vrot.slane %v958_v53, 7  ;;  %v3948_v0 = vpack.c.bf16 %v683_v41, %v683_v41  ;;  %v3946_v1 = vpack.c.bf16 %v681_v42, %v681_v42  ;;  %v4777_v13 = vld [vmem:[#allocation2 + $0x14] sm:$0x1]  ;;  %v1234_v31 = vld [vmem:[#allocation2 + $0x68] sm:$0x1] }
 0x10b   : > { %v955_v2 = vsel %vm4695_vm8, %v947_v16, %v954_v57  ;;  %v1221_v3 = vsel %vm4701_vm9, %v956_v58, %v1220_v38  ;;  %v938_v4 = vsel %vm4695_vm8, %v930_v18, %v937_v59  ;;  %v1214_v5 = vsel %vm4701_vm9, %v939_v60, %v1213_v47  ;;  %v1227_v33 = vld [vmem:[#allocation2 + $0x5c] sm:$0x1]  ;;  %v4803_v44 = vld [vmem:[#allocation2 + $0x18] sm:$0xf]  ;;  %v4486_v18 = vld [vmem:[#allocation2 + $0x30] sm:$0xf] }
 0x10c   : > { %1219 = vst.msk [vmem:[#allocation2 + $0x4c] sm:$0xf] %vm716_vm2, %v955_v2  ;;  %1222 = vst [vmem:[#allocation2 + $0x50] sm:$0x1] %v1221_v3  ;;  %v980_v9 = vor.u32 %v978_v52, %v977_v61  ;;  %v981_v10 = vrot.slane %v977_v61, 4  ;;  %v963_v11 = vor.u32 %v961_v54, %v960_v63  ;;  %v964_v12 = vrot.slane %v960_v63, 4 }
 0x10d   : > { %1212 = vst.msk [vmem:[#allocation2 + $0x40] sm:$0xf] %vm716_vm2, %v938_v4  ;;  %1215 = vst [vmem:[#allocation2 + $0x44] sm:$0x1] %v1214_v5  ;;  %v983_v14 = vshrl.u32 %v3948_v0, 16  ;;  %v986_v15 = vshll.u32 %v3948_v0, 16  ;;  %v606_v29 = vadd.f32 %v4679_v19, %v605_v43  ;;  %v617_v37 = vadd.f32 %v4120_v50, %v4679_v19 }
 0x10e   : > { %v966_v16 = vshrl.u32 %v3946_v1, 16  ;;  %v969_v17 = vshll.u32 %v3946_v1, 16  ;;  %v4785_v20 = vpop.f32.mrb[20].mxu0  ;;  %v1231_v21 = vsel %vm4688_vm7, %v980_v9, %v1230_v6  ;;  %v1224_v22 = vsel %vm4688_vm7, %v963_v11, %v1223_v7  ;;  %v4805_v43 = vld [vmem:[#allocation2 + $0x1c] sm:$0xf] }
 0x10f   : > { %v686_v23 = vmax.f32 %v614_v48, 0.0  ;;  %v1794_v24 = vrot.slane %v4773_v8, 5  ;;  %v4792_v25 = vpop.f32.mrb[21].mxu0  ;;  %1232 = vst [vmem:[#allocation2 + $0x60] sm:$0xf] %v1231_v21  ;;  %v985_v26 = vrot.slane %v983_v14, 7  ;;  %v609_v63 = vadd.f32 %v4679_v19, %v4763_v55 }
 0x110   : > { %1225 = vst [vmem:[#allocation2 + $0x54] sm:$0xf] %v1224_v22  ;;  %v968_v27 = vrot.slane %v966_v16, 7  ;;  %v1797_v28 = vrot.slane %v4777_v13, 5  ;;  %v4796_v30 = vpop.f32.mrb[22].mxu0  ;;  %v684_v51 = vmax.f32 %v606_v29, 0.0 }
 0x111   : > { %v3951_v34 = vpack.c.bf16 %v686_v23, %v686_v23  ;;  %v1795_v35 = vsel %vm4781_vm12, %v3740_v49, %v1794_v24  ;;  %v1796_v36 = vrot.slane %v1794_v24, 4  ;;  %v4801_v38 = vpop.f32.mrb[23].mxu0  ;;  %v988_v39 = vor.u32 %v986_v15, %v985_v26  ;;  %v4809_v49 = vld [vmem:[#allocation2 + $0x20] sm:$0x1]  ;;  %v1244_v61 = vld [vmem:[#allocation2 + $0x78] sm:$0xf] }
 0x112   : > { %v990_v40 = vrot.slane %v985_v26, 4  ;;  %v971_v41 = vor.u32 %v969_v17, %v968_v27  ;;  %v973_v42 = vrot.slane %v968_v27, 4  ;;  %v3949_v59 = vpack.c.bf16 %v684_v51, %v684_v51  ;;  %v1237_v23 = vld [vmem:[#allocation2 + $0x6c] sm:$0xf] }
 0x113   : > { %v1009_v45 = vshrl.u32 %v3951_v34, 16  ;;  %v1012_v47 = vshll.u32 %v3951_v34, 16  ;;  %v1798_v48 = vsel %vm4781_vm12, %v1796_v36, %v1797_v28  ;;  %v989_v50 = vsel %vm4695_vm8, %v981_v10, %v988_v39 }
 0x114   : > { %v1235_v52 = vsel %vm4701_vm9, %v990_v40, %v1234_v31  ;;  %v972_v53 = vsel %vm4695_vm8, %v964_v12, %v971_v41  ;;  %v1228_v54 = vsel %vm4701_vm9, %v973_v42, %v1227_v33  ;;  %1233 = vst.msk [vmem:[#allocation2 + $0x64] sm:$0xf] %vm716_vm2, %v989_v50  ;;  %v3788_v58 = vcombine.low %v1795_v35, %v1798_v48  ;;  %v1248_v40 = vld [vmem:[#allocation2 + $0x80] sm:$0x1] }
 0x115   : > { %1236 = vst [vmem:[#allocation2 + $0x68] sm:$0x1] %v1235_v52  ;;  %1226 = vst.msk [vmem:[#allocation2 + $0x58] sm:$0xf] %vm716_vm2, %v972_v53  ;;  %v4821_v57 = vrot.slane %v1009_v45, 7  ;;  %v687_v60 = vmax.f32 %v617_v37, 0.0 }
 0x116   : > { %1229 = vst [vmem:[#allocation2 + $0x5c] sm:$0x1] %v1228_v54  ;;  %v3741_v0 = vrot.slane %v4803_v44, 9  ;;  %v1801_v1 = vrot.slane %v4805_v43, 5  ;;  %v1804_v2 = vrot.slane %v4809_v49, 5  ;;  %v4828_v3 = vpop.f32.mrb[24].mxu0  ;;  %2075 = vrot.lane.b32.xlu1 %v3788_v58, %s4515_s19 }
 0x117   : > { %v1014_v4 = vor.u32 %v1012_v47, %v4821_v57  ;;  %v1015_v5 = vrot.slane %v4821_v57, 4  ;;  %v992_v6 = vshrl.u32 %v3949_v59, 16  ;;  %v995_v7 = vshll.u32 %v3949_v59, 16  ;;  %v4833_v9 = vpop.f32.mrb[25].mxu0  ;;  %v1241_v53 = vld [vmem:[#allocation2 + $0x74] sm:$0x1] }
 0x118   : > { %v3952_v55 = vpack.c.bf16 %v687_v60, %v687_v60  ;;  %v685_v10 = vmax.f32 %v609_v63, 0.0  ;;  %v1802_v11 = vsel %vm4781_vm12, %v3741_v0, %v1801_v1  ;;  %v1803_v12 = vrot.slane %v1801_v1, 4  ;;  %v4837_v14 = vpop.f32.mrb[26].mxu0 }
 0x119   : > { %v1245_v15 = vsel %vm4688_vm7, %v1014_v4, %v1244_v61  ;;  %v994_v16 = vrot.slane %v992_v6, 7  ;;  %v1375_v17 = vshrl.u32 %v4759_v32, 16  ;;  %v1378_v21 = vshll.u32 %v4759_v32, 16  ;;  %v4843_v22 = vpop.f32.mrb[27].mxu0 }
 0x11a   : > { %1246 = vst [vmem:[#allocation2 + $0x78] sm:$0xf] %v1245_v15  ;;  %v1017_v24 = vshrl.u32 %v3952_v55, 16  ;;  %v1020_v26 = vshll.u32 %v3952_v55, 16  ;;  %v3950_v27 = vpack.c.bf16 %v685_v10, %v685_v10  ;;  %v1805_v28 = vsel %vm4781_vm12, %v1803_v12, %v1804_v2 }
 0x11b   : > { %v997_v29 = vor.u32 %v995_v7, %v994_v16  ;;  %v998_v31 = vrot.slane %v994_v16, 4  ;;  %v3789_v33 = vcombine.low %v1802_v11, %v1805_v28  ;;  %v1377_v34 = vrot.slane %v1375_v17, 4 }
 0x11c   : > { %v1019_v35 = vrot.slane %v1017_v24, 7  ;;  %v1000_v36 = vshrl.u32 %v3950_v27, 16  ;;  %v1003_v37 = vshll.u32 %v3950_v27, 16  ;;  %v1380_v39 = vrot.slane %v1378_v21, 5 }
 0x11d   : > { %v1238_v32 = vsel %vm4688_vm7, %v997_v29, %v1237_v23  ;;  %2077 = vrot.lane.b32.xlu1 %v3789_v33, %s4515_s19  ;;  %v1384_v41 = vshll.u32 %v4773_v8, 16  ;;  %v1388_v42 = vshrl.u32 %v4773_v8, 16  ;;  %v1394_v45 = vshll.u32 %v4777_v13, 16  ;;  %v4853_v52 = vpop.f32.mrb[28].mxu0 }
 0x11e   : > { %1239 = vst [vmem:[#allocation2 + $0x6c] sm:$0xf] %v1238_v32  ;;  %v1022_v47 = vor.u32 %v1020_v26, %v1019_v35  ;;  %v1024_v48 = vrot.slane %v1019_v35, 4  ;;  %v1002_v51 = vrot.slane %v1000_v36, 7  ;;  %v1381_v50 = vor.u32 %v1380_v39, %v1377_v34  ;;  %v4857_v60 = vpop.f32.mrb[29].mxu0 }
 0x11f   : > { %v1386_v54 = vrot.slane %v1384_v41, 5  ;;  %v1390_v57 = vrot.slane %v1388_v42, 4  ;;  %v1396_v58 = vrot.slane %v1394_v45, 5  ;;  %v630_v59 = vadd.f32 %v4785_v20, %v4679_v19  ;;  %v4869_v1 = vpop.f32.mrb[30].mxu0  ;;  %v1258_v32 = vld [vmem:[#allocation2 + $0x90] sm:$0xf] }
 0x120   : > { %v1023_v8 = vsel %vm4695_vm8, %v1015_v5, %v1022_v47  ;;  %v1249_v13 = vsel %vm4701_vm9, %v1024_v48, %v1248_v40  ;;  %v1005_v61 = vor.u32 %v1003_v37, %v1002_v51  ;;  %v1007_v63 = vrot.slane %v1002_v51, 4  ;;  %v4873_v6 = vpop.f32.mrb[31].mxu0 }
 0x121   : > { %1247 = vst.msk [vmem:[#allocation2 + $0x7c] sm:$0xf] %vm716_vm2, %v1023_v8  ;;  %1250 = vst [vmem:[#allocation2 + $0x80] sm:$0x1] %v1249_v13  ;;  %v1382_v20 = vrot.slane %v1381_v50, 4  ;;  %v1391_v2 = vor.u32 %v1390_v57, %v1386_v54  ;;  %v690_v4 = vmax.f32 %v630_v59, 0.0  ;;  %v622_v29 = vadd.f32 %v4679_v19, %v4792_v25 }
 0x122   : > { %v1399_v5 = vshrl.u32 %v4803_v44, 16  ;;  %v1006_v7 = vsel %vm4695_vm8, %v998_v31, %v1005_v61  ;;  %v1242_v55 = vsel %vm4701_vm9, %v1007_v63, %v1241_v53  ;;  %v1402_v10 = vshll.u32 %v4803_v44, 16  ;;  %v4890_v31 = vld [vmem:[#allocation2 + $0x30] sm:$0xf]  ;;  %v5064_v62 = vld [vmem:[#allocation2 + $0x78] sm:$0xf] }
 0x123   : > { %v1408_v11 = vshll.u32 %v4805_v43, 16  ;;  %1240 = vst.msk [vmem:[#allocation2 + $0x70] sm:$0xf] %vm716_vm2, %v1006_v7  ;;  %1243 = vst [vmem:[#allocation2 + $0x74] sm:$0x1] %v1242_v55  ;;  %v1387_v12 = vsel %vm4865_vm15, %v1382_v20, %v1386_v54  ;;  %v1392_v15 = vrot.slane %v1391_v2, 4  ;;  %v3955_v16 = vpack.c.bf16 %v690_v4, %v690_v4 }
 0x124   : > { %v1401_v17 = vrot.slane %v1399_v5, 4  ;;  %v1404_v21 = vrot.slane %v1402_v10, 5  ;;  %v1412_v24 = vshrl.u32 %v4805_v43, 16  ;;  %v1418_v26 = vshll.u32 %v4809_v49, 16  ;;  %v4912_v2 = vld [vmem:[#allocation2 + $0x24] sm:$0xf] }
 0x125   : > { %v1410_v23 = vrot.slane %v1408_v11, 5  ;;  %v1397_v44 = vsel %vm4865_vm15, %v1392_v15, %v1396_v58  ;;  %v1043_v27 = vshrl.u32 %v3955_v16, 16  ;;  %v1046_v28 = vshll.u32 %v3955_v16, 16  ;;  %v4914_v10 = vld [vmem:[#allocation2 + $0x38] sm:$0x1] }
 0x126   : > { %v3772_v33 = vcombine.low %v1387_v12, %v1397_v44  ;;  %v1405_v34 = vor.u32 %v1404_v21, %v1401_v17  ;;  %v1414_v35 = vrot.slane %v1412_v24, 4  ;;  %v1420_v36 = vrot.slane %v1418_v26, 5  ;;  %v1251_v11 = vld [vmem:[#allocation2 + $0x84] sm:$0xf]  ;;  %v1262_v44 = vld [vmem:[#allocation2 + $0x98] sm:$0x1] }
 0x127   : > { %v4892_v37 = vrot.slane %v1043_v27, 7  ;;  %v688_v39 = vmax.f32 %v622_v29, 0.0  ;;  %v633_v43 = vadd.f32 %v4796_v30, %v4679_v19  ;;  %v625_v49 = vadd.f32 %v4679_v19, %v4801_v38  ;;  %v4903_v30 = vld [vmem:[#allocation2 + $0x34] sm:$0xf] }
 0x128   : > { %1995 = vrot.lane.b32.xlu0 %v3772_v33, %s4516_s20  ;;  %v1406_v25 = vrot.slane %v1405_v34, 4  ;;  %v1415_v40 = vor.u32 %v1414_v35, %v1410_v23  ;;  %v1447_v41 = vshrl.u32 %v4890_v31, 16  ;;  %v1450_v42 = vshll.u32 %v4890_v31, 16 }
 0x129   : > { %v1048_v45 = vor.u32 %v1046_v28, %v4892_v37  ;;  %v1049_v47 = vrot.slane %v4892_v37, 4  ;;  %v3953_v48 = vpack.c.bf16 %v688_v39, %v688_v39  ;;  %v691_v51 = vmax.f32 %v633_v43, 0.0  ;;  %v1255_v37 = vld [vmem:[#allocation2 + $0x8c] sm:$0x1]  ;;  %v1303_v43 = vld [vmem:[#allocation2 + $0x28] sm:$0xf] }
 0x12a   : > { %v1411_v38 = vsel %vm4865_vm15, %v1406_v25, %v1410_v23  ;;  %v1416_v50 = vrot.slane %v1415_v40, 4  ;;  %v689_v53 = vmax.f32 %v625_v49, 0.0  ;;  %v1449_v54 = vrot.slane %v1447_v41, 4  ;;  %v1304_v41 = vld [vmem:[#allocation2 + $0x2c] sm:$0x1] }
 0x12b   : > { %v1259_v57 = vsel %vm4688_vm7, %v1048_v45, %v1258_v32  ;;  %v1026_v58 = vshrl.u32 %v3953_v48, 16  ;;  %v1029_v59 = vshll.u32 %v3953_v48, 16  ;;  %v3956_v8 = vpack.c.bf16 %v691_v51, %v691_v51 }
 0x12c   : > { %1260 = vst [vmem:[#allocation2 + $0x90] sm:$0xf] %v1259_v57  ;;  %v1421_v13 = vsel %vm4865_vm15, %v1416_v50, %v1420_v36  ;;  %v3954_v61 = vpack.c.bf16 %v689_v53, %v689_v53  ;;  %v1452_v63 = vrot.slane %v1450_v42, 5  ;;  %v1456_v20 = vshll.u32 %v4903_v30, 16 }
 0x12d   : > { %v3773_v4 = vcombine.low %v1411_v38, %v1421_v13  ;;  %v1028_v5 = vrot.slane %v1026_v58, 7  ;;  %v1051_v7 = vshrl.u32 %v3956_v8, 16  ;;  %v1054_v55 = vshll.u32 %v3956_v8, 16 }
 0x12e   : > { %v1034_v12 = vshrl.u32 %v3954_v61, 16  ;;  %v1037_v15 = vshll.u32 %v3954_v61, 16  ;;  %v1453_v16 = vor.u32 %v1452_v63, %v1449_v54  ;;  %v1458_v17 = vrot.slane %v1456_v20, 5 }
 0x12f   : > { %1997 = vrot.lane.b32.xlu0 %v3773_v4, %s4516_s20  ;;  %v1031_v21 = vor.u32 %v1029_v59, %v1028_v5  ;;  %v1032_v23 = vrot.slane %v1028_v5, 4  ;;  %v1053_v24 = vrot.slane %v1051_v7, 7  ;;  %v1460_v26 = vshrl.u32 %v4903_v30, 16 }
 0x130   : > { %v1036_v27 = vrot.slane %v1034_v12, 7  ;;  %v1454_v28 = vrot.slane %v1453_v16, 4  ;;  %v1466_v29 = vshll.u32 %v4914_v10, 16  ;;  %v1423_v33 = vshrl.u32 %v4912_v2, 16 }
 0x131   : > { %v1252_v34 = vsel %vm4688_vm7, %v1031_v21, %v1251_v11  ;;  %v1056_v35 = vor.u32 %v1054_v55, %v1053_v24  ;;  %v1058_v36 = vrot.slane %v1053_v24, 4  ;;  %v1462_v39 = vrot.slane %v1460_v26, 4 }
 0x132   : > { %1253 = vst [vmem:[#allocation2 + $0x84] sm:$0xf] %v1252_v34  ;;  %v1039_v49 = vor.u32 %v1037_v15, %v1036_v27  ;;  %v1041_v32 = vrot.slane %v1036_v27, 4  ;;  %v1459_v25 = vsel %vm4865_vm15, %v1454_v28, %v1458_v17  ;;  %v1468_v40 = vrot.slane %v1466_v29, 5  ;;  %v4956_v34 = vld [vmem:[#allocation2 + $0x48] sm:$0xf] }
 0x133   : > { %v1057_v42 = vsel %vm4695_vm8, %v1049_v47, %v1056_v35  ;;  %v1263_v45 = vsel %vm4701_vm9, %v1058_v36, %v1262_v44  ;;  %v1463_v48 = vor.u32 %v1462_v39, %v1458_v17  ;;  %v1425_v51 = vrot.slane %v1423_v33, 4 }
 0x134   : > { %1261 = vst.msk [vmem:[#allocation2 + $0x94] sm:$0xf] %vm716_vm2, %v1057_v42  ;;  %1264 = vst [vmem:[#allocation2 + $0x98] sm:$0x1] %v1263_v45  ;;  %v1040_v38 = vsel %vm4695_vm8, %v1032_v23, %v1039_v49  ;;  %v1256_v50 = vsel %vm4701_vm9, %v1041_v32, %v1255_v37  ;;  %v1426_v53 = vshll.u32 %v4912_v2, 16  ;;  %v1432_v54 = vshll.u32 %v1303_v43, 16 }
 0x135   : > { %1254 = vst.msk [vmem:[#allocation2 + $0x88] sm:$0xf] %vm716_vm2, %v1040_v38  ;;  %1257 = vst [vmem:[#allocation2 + $0x8c] sm:$0x1] %v1256_v50  ;;  %v1464_v47 = vrot.slane %v1463_v48, 4  ;;  %v1436_v57 = vshrl.u32 %v1303_v43, 16  ;;  %v646_v7 = vadd.f32 %v4828_v3, %v4679_v19  ;;  %v638_v3 = vadd.f32 %v4679_v19, %v4833_v9 }
 0x136   : > { %v1442_v58 = vshll.u32 %v1304_v41, 16  ;;  %v3743_v59 = vrot.slane %v4890_v31, 9  ;;  %v1428_v8 = vrot.slane %v1426_v53, 5  ;;  %v1434_v13 = vrot.slane %v1432_v54, 5 }
 0x137   : > { %v1815_v61 = vrot.slane %v4903_v30, 5  ;;  %v1818_v63 = vrot.slane %v4914_v10, 5  ;;  %v1469_v20 = vsel %vm4865_vm15, %v1464_v47, %v1468_v40  ;;  %v1438_v4 = vrot.slane %v1436_v57, 4 }
 0x138   : > { %v1444_v5 = vrot.slane %v1442_v58, 5  ;;  %v3775_v55 = vcombine.low %v1459_v25, %v1469_v20  ;;  %v1429_v11 = vor.u32 %v1428_v8, %v1425_v51  ;;  %v694_v16 = vmax.f32 %v646_v7, 0.0 }
 0x139   : > { %v1816_v12 = vsel %vm4781_vm12, %v3743_v59, %v1815_v61  ;;  %v1817_v31 = vrot.slane %v1815_v61, 4  ;;  %v1439_v15 = vor.u32 %v1438_v4, %v1434_v13  ;;  %v3742_v30 = vrot.slane %v4912_v2, 9  ;;  %v4970_v59 = vld [vmem:[#allocation2 + $0x50] sm:$0x1]  ;;  %v1265_v61 = vld [vmem:[#allocation2 + $0x9c] sm:$0xf] }
 0x13a   : > { %v1808_v17 = vrot.slane %v1303_v43, 5  ;;  %2001 = vrot.lane.b32.xlu1 %v3775_v55, %s4516_s20  ;;  %v1430_v10 = vrot.slane %v1429_v11, 4  ;;  %v1811_v23 = vrot.slane %v1304_v41, 5  ;;  %v3959_v44 = vpack.c.bf16 %v694_v16, %v694_v16  ;;  %v1276_v11 = vld [vmem:[#allocation2 + $0xb0] sm:$0x1] }
 0x13b   : > { %v1819_v21 = vsel %vm4781_vm12, %v1817_v31, %v1818_v63  ;;  %v1440_v24 = vrot.slane %v1439_v15, 4  ;;  %v692_v29 = vmax.f32 %v638_v3, 0.0  ;;  %v649_v33 = vadd.f32 %v4837_v14, %v4679_v19  ;;  %v1272_v14 = vld [vmem:[#allocation2 + $0xa8] sm:$0xf]  ;;  %v1269_v3 = vld [vmem:[#allocation2 + $0xa4] sm:$0x1] }
 0x13c   : > { %v3791_v26 = vcombine.low %v1816_v12, %v1819_v21  ;;  %v1809_v27 = vsel %vm4781_vm12, %v3742_v30, %v1808_v17  ;;  %v1435_v2 = vsel %vm4865_vm15, %v1430_v10, %v1434_v13  ;;  %v1810_v28 = vrot.slane %v1808_v17, 4  ;;  %v4978_v17 = vld [vmem:[#allocation2 + $0x3c] sm:$0xf] }
 0x13d   : > { %v1445_v35 = vsel %vm4865_vm15, %v1440_v24, %v1444_v5  ;;  %v1077_v9 = vshrl.u32 %v3959_v44, 16  ;;  %v1080_v36 = vshll.u32 %v3959_v44, 16  ;;  %v641_v37 = vadd.f32 %v4679_v19, %v4843_v22  ;;  %v4967_v19 = vld [vmem:[#allocation2 + $0x4c] sm:$0xf] }
 0x13e   : > { %v3774_v39 = vcombine.low %v1435_v2, %v1445_v35  ;;  %2081 = vrot.lane.b32.xlu1 %v3791_v26, %s4515_s19  ;;  %v1812_v43 = vsel %vm4781_vm12, %v1810_v28, %v1811_v23  ;;  %v3957_v49 = vpack.c.bf16 %v692_v29, %v692_v29  ;;  %v695_v32 = vmax.f32 %v649_v33, 0.0  ;;  %v4982_v26 = vld [vmem:[#allocation2 + $0x40] sm:$0xf]  ;;  %v1310_v29 = vld [vmem:[#allocation2 + $0x44] sm:$0x1] }
 0x13f   : > { %v1079_v25 = vrot.slane %v1077_v9, 7  ;;  %v3790_v40 = vcombine.low %v1809_v27, %v1812_v43  ;;  %v693_v41 = vmax.f32 %v641_v37, 0.0  ;;  %v1495_v42 = vshrl.u32 %v4956_v34, 16 }
 0x140   : > { %1999 = vrot.lane.b32.xlu0 %v3774_v39, %s4516_s20  ;;  %v1060_v45 = vshrl.u32 %v3957_v49, 16  ;;  %v1063_v48 = vshll.u32 %v3957_v49, 16  ;;  %v3960_v51 = vpack.c.bf16 %v695_v32, %v695_v32  ;;  %v1498_v22 = vshll.u32 %v4956_v34, 16 }
 0x141   : > { %v1082_v38 = vor.u32 %v1080_v36, %v1079_v25  ;;  %v1083_v50 = vrot.slane %v1079_v25, 4  ;;  %v3958_v53 = vpack.c.bf16 %v693_v41, %v693_v41  ;;  %v1497_v54 = vrot.slane %v1495_v42, 4 }
 0x142   : > { %v1062_v47 = vrot.slane %v1060_v45, 7  ;;  %v1085_v57 = vshrl.u32 %v3960_v51, 16  ;;  %v1088_v58 = vshll.u32 %v3960_v51, 16  ;;  %v1500_v8 = vrot.slane %v1498_v22, 5 }
 0x143   : > { %v1273_v13 = vsel %vm4688_vm7, %v1082_v38, %v1272_v14  ;;  %v1068_v63 = vshrl.u32 %v3958_v53, 16  ;;  %v1071_v20 = vshll.u32 %v3958_v53, 16  ;;  %v1504_v4 = vshll.u32 %v4967_v19, 16 }
 0x144   : > { %1274 = vst [vmem:[#allocation2 + $0xa8] sm:$0xf] %v1273_v13  ;;  %2079 = vrot.lane.b32.xlu0 %v3790_v40, %s4515_s19  ;;  %v1065_v5 = vor.u32 %v1063_v48, %v1062_v47  ;;  %v1066_v7 = vrot.slane %v1062_v47, 4  ;;  %v1087_v55 = vrot.slane %v1085_v57, 7  ;;  %v1501_v12 = vor.u32 %v1500_v8, %v1497_v54 }
 0x145   : > { %v1070_v31 = vrot.slane %v1068_v63, 7  ;;  %v1506_v15 = vrot.slane %v1504_v4, 5  ;;  %v1508_v16 = vshrl.u32 %v4967_v19, 16  ;;  %v1514_v30 = vshll.u32 %v4970_v59, 16 }
 0x146   : > { %v1266_v10 = vsel %vm4688_vm7, %v1065_v5, %v1265_v61  ;;  %v1090_v21 = vor.u32 %v1088_v58, %v1087_v55  ;;  %v1092_v23 = vrot.slane %v1087_v55, 4  ;;  %v1502_v24 = vrot.slane %v1501_v12, 4 }
 0x147   : > { %1267 = vst [vmem:[#allocation2 + $0x9c] sm:$0xf] %v1266_v10  ;;  %v1073_v44 = vor.u32 %v1071_v20, %v1070_v31  ;;  %v1075_v27 = vrot.slane %v1070_v31, 4  ;;  %v1510_v2 = vrot.slane %v1508_v16, 4  ;;  %v1516_v28 = vrot.slane %v1514_v30, 5 }
 0x148   : > { %v1091_v33 = vsel %vm4695_vm8, %v1083_v50, %v1090_v21  ;;  %v1277_v35 = vsel %vm4701_vm9, %v1092_v23, %v1276_v11  ;;  %v1507_v9 = vsel %vm4865_vm15, %v1502_v24, %v1506_v15  ;;  %v1471_v36 = vshrl.u32 %v4978_v17, 16  ;;  %v5017_v11 = vld [vmem:[#allocation2 + $0x60] sm:$0xf]  ;;  %v5029_v24 = vld [vmem:[#allocation2 + $0x64] sm:$0xf] }
 0x149   : > { %1275 = vst.msk [vmem:[#allocation2 + $0xac] sm:$0xf] %vm716_vm2, %v1091_v33  ;;  %1278 = vst [vmem:[#allocation2 + $0xb0] sm:$0x1] %v1277_v35  ;;  %v1074_v37 = vsel %vm4695_vm8, %v1066_v7, %v1073_v44  ;;  %v1270_v39 = vsel %vm4701_vm9, %v1075_v27, %v1269_v3  ;;  %v1511_v43 = vor.u32 %v1510_v2, %v1506_v15  ;;  %v1474_v49 = vshll.u32 %v4978_v17, 16 }
 0x14a   : > { %1268 = vst.msk [vmem:[#allocation2 + $0xa0] sm:$0xf] %vm716_vm2, %v1074_v37  ;;  %1271 = vst [vmem:[#allocation2 + $0xa4] sm:$0x1] %v1270_v39  ;;  %v1473_v32 = vrot.slane %v1471_v36, 4  ;;  %v1480_v25 = vshll.u32 %v4982_v26, 16 }
 0x14b   : > { %v1484_v14 = vshrl.u32 %v4982_v26, 16  ;;  %v1490_v40 = vshll.u32 %v1310_v29, 16  ;;  %v1512_v41 = vrot.slane %v1511_v43, 4  ;;  %v1476_v42 = vrot.slane %v1474_v49, 5  ;;  %v1286_v36 = vld [vmem:[#allocation2 + $0xc0] sm:$0xf] }
 0x14c   : > { %v3745_v45 = vrot.slane %v4956_v34, 9  ;;  %v1829_v48 = vrot.slane %v4967_v19, 5  ;;  %v1482_v51 = vrot.slane %v1480_v25, 5  ;;  %v1832_v50 = vrot.slane %v4970_v59, 5  ;;  %v4479_v34 = vld [vmem:[%s5733_s2] ss:$0 sm:$0xff] }
 0x14d   : > { %v1486_v22 = vrot.slane %v1484_v14, 4  ;;  %v1492_v38 = vrot.slane %v1490_v40, 5  ;;  %v1517_v53 = vsel %vm4865_vm15, %v1512_v41, %v1516_v28  ;;  %v1477_v54 = vor.u32 %v1476_v42, %v1473_v32  ;;  %v1279_v49 = vld [vmem:[#allocation2 + $0xb4] sm:$0xf] }
 0x14e   : > { %v1830_v47 = vsel %vm4781_vm12, %v3745_v45, %v1829_v48  ;;  %v1831_v57 = vrot.slane %v1829_v48, 4  ;;  %v3777_v58 = vcombine.low %v1507_v9, %v1517_v53  ;;  %v662_v19 = vadd.f32 %v4479_v34, %v4853_v52  ;;  %v1319_v53 = vld [vmem:[#allocation2 + $0x68] sm:$0x1] }
 0x14f   : > { %v1487_v8 = vor.u32 %v1486_v22, %v1482_v51  ;;  %v3744_v13 = vrot.slane %v4978_v17, 9  ;;  %v1478_v61 = vrot.slane %v1477_v54, 4  ;;  %v1822_v63 = vrot.slane %v4982_v26, 5 }
 0x150   : > { %v1833_v59 = vsel %vm4781_vm12, %v1831_v57, %v1832_v50  ;;  %v1825_v20 = vrot.slane %v1310_v29, 5  ;;  %2005 = vrot.lane.b32.xlu1 %v3777_v58, %s4516_s20  ;;  %v698_v7 = vmax.f32 %v662_v19, 0.0  ;;  %v654_v55 = vadd.f32 %v4479_v34, %v4857_v60 }
 0x151   : > { %v1488_v4 = vrot.slane %v1487_v8, 4  ;;  %v3793_v5 = vcombine.low %v1830_v47, %v1833_v59  ;;  %v1483_v52 = vsel %vm4865_vm15, %v1478_v61, %v1482_v51  ;;  %v1823_v12 = vsel %vm4781_vm12, %v3744_v13, %v1822_v63  ;;  %v5036_v51 = vld [vmem:[#allocation2 + $0x54] sm:$0xf]  ;;  %v1290_v8 = vld [vmem:[#allocation2 + $0xc8] sm:$0x1] }
 0x152   : > { %v1824_v31 = vrot.slane %v1822_v63, 4  ;;  %v665_v15 = vadd.f32 %v4479_v34, %v4869_v1  ;;  %v3963_v30 = vpack.c.bf16 %v698_v7, %v698_v7  ;;  %v696_v10 = vmax.f32 %v654_v55, 0.0  ;;  %v1283_v59 = vld [vmem:[#allocation2 + $0xbc] sm:$0x1]  ;;  %v5044_v7 = vld [vmem:[#allocation2 + $0x58] sm:$0xf] }
 0x153   : > { %v1493_v16 = vsel %vm4865_vm15, %v1488_v4, %v1492_v38  ;;  %v657_v21 = vadd.f32 %v4479_v34, %v4873_v6  ;;  %v1543_v44 = vshrl.u32 %v5017_v11, 16  ;;  %v1546_v35 = vshll.u32 %v5017_v11, 16 }
 0x154   : > { %v3776_v23 = vcombine.low %v1483_v52, %v1493_v16  ;;  %v1826_v60 = vsel %vm4781_vm12, %v1824_v31, %v1825_v20  ;;  %v699_v3 = vmax.f32 %v665_v15, 0.0  ;;  %2085 = vrot.lane.b32.xlu1 %v3793_v5, %s4515_s19  ;;  %v1111_v27 = vshrl.u32 %v3963_v30, 16  ;;  %v1316_v16 = vld [vmem:[#allocation2 + $0x5c] sm:$0x1] }
 0x155   : > { %v1114_v1 = vshll.u32 %v3963_v30, 16  ;;  %v3792_v2 = vcombine.low %v1823_v12, %v1826_v60  ;;  %v3961_v28 = vpack.c.bf16 %v696_v10, %v696_v10  ;;  %v697_v33 = vmax.f32 %v657_v21, 0.0 }
 0x156   : > { %2003 = vrot.lane.b32.xlu0 %v3776_v23, %s4516_s20  ;;  %v3964_v29 = vpack.c.bf16 %v699_v3, %v699_v3  ;;  %v1545_v6 = vrot.slane %v1543_v44, 4  ;;  %v1113_v9 = vrot.slane %v1111_v27, 7  ;;  %v1552_v43 = vshll.u32 %v5029_v24, 16 }
 0x157   : > { %v1094_v37 = vshrl.u32 %v3961_v28, 16  ;;  %v1097_v39 = vshll.u32 %v3961_v28, 16  ;;  %v3962_v14 = vpack.c.bf16 %v697_v33, %v697_v33  ;;  %v1548_v40 = vrot.slane %v1546_v35, 5 }
 0x158   : > { %v1119_v32 = vshrl.u32 %v3964_v29, 16  ;;  %v1122_v25 = vshll.u32 %v3964_v29, 16  ;;  %v1116_v41 = vor.u32 %v1114_v1, %v1113_v9  ;;  %v1117_v42 = vrot.slane %v1113_v9, 4 }
 0x159   : > { %v1096_v45 = vrot.slane %v1094_v37, 7  ;;  %v1554_v48 = vrot.slane %v1552_v43, 5  ;;  %v1102_v38 = vshrl.u32 %v3962_v14, 16  ;;  %v1105_v50 = vshll.u32 %v3962_v14, 16 }
 0x15a   : > { %2083 = vrot.lane.b32.xlu0 %v3792_v2, %s4515_s19  ;;  %v1121_v22 = vrot.slane %v1119_v32, 7  ;;  %v1549_v54 = vor.u32 %v1548_v40, %v1545_v6  ;;  %v1287_v47 = vsel %vm4688_vm7, %v1116_v41, %v1286_v36  ;;  %v1556_v34 = vshrl.u32 %v5029_v24, 16 }
 0x15b   : > { %v1099_v57 = vor.u32 %v1097_v39, %v1096_v45  ;;  %v1100_v58 = vrot.slane %v1096_v45, 4  ;;  %1288 = vst [vmem:[#allocation2 + $0xc0] sm:$0xf] %v1287_v47  ;;  %v1104_v61 = vrot.slane %v1102_v38, 7  ;;  %v1562_v5 = vshll.u32 %v1319_v53, 16 }
 0x15c   : > { %v1124_v19 = vor.u32 %v1122_v25, %v1121_v22  ;;  %v1126_v13 = vrot.slane %v1121_v22, 4  ;;  %v1550_v63 = vrot.slane %v1549_v54, 4  ;;  %v1558_v4 = vrot.slane %v1556_v34, 4  ;;  %v5069_v39 = vld [vmem:[#allocation2 + $0x7c] sm:$0xf] }
 0x15d   : > { %v1280_v20 = vsel %vm4688_vm7, %v1099_v57, %v1279_v49  ;;  %v1519_v55 = vshrl.u32 %v5036_v51, 16  ;;  %v1107_v31 = vor.u32 %v1105_v50, %v1104_v61  ;;  %v1109_v15 = vrot.slane %v1104_v61, 4  ;;  %v1325_v22 = vld [vmem:[#allocation2 + $0x80] sm:$0x1]  ;;  %v5086_v61 = vld [vmem:[#allocation2 + $0x70] sm:$0xf] }
 0x15e   : > { %1281 = vst [vmem:[#allocation2 + $0xb4] sm:$0xf] %v1280_v20  ;;  %v1125_v52 = vsel %vm4695_vm8, %v1117_v42, %v1124_v19  ;;  %v1291_v12 = vsel %vm4701_vm9, %v1126_v13, %v1290_v8  ;;  %v1555_v46 = vsel %vm4865_vm15, %v1550_v63, %v1554_v48  ;;  %v1559_v30 = vor.u32 %v1558_v4, %v1554_v48 }
 0x15f   : > { %1289 = vst.msk [vmem:[#allocation2 + $0xc4] sm:$0xf] %vm716_vm2, %v1125_v52  ;;  %1292 = vst [vmem:[#allocation2 + $0xc8] sm:$0x1] %v1291_v12  ;;  %v1564_v10 = vrot.slane %v1562_v5, 5  ;;  %v1521_v21 = vrot.slane %v1519_v55, 4  ;;  %v1108_v23 = vsel %vm4695_vm8, %v1100_v58, %v1107_v31  ;;  %v1284_v60 = vsel %vm4701_vm9, %v1109_v15, %v1283_v59 }
 0x160   : > { %v1522_v3 = vshll.u32 %v5036_v51, 16  ;;  %v1528_v44 = vshll.u32 %v5044_v7, 16  ;;  %1282 = vst.msk [vmem:[#allocation2 + $0xb8] sm:$0xf] %vm716_vm2, %v1108_v23  ;;  %1285 = vst [vmem:[#allocation2 + $0xbc] sm:$0x1] %v1284_v60 }
 0x161   : > { %v1560_v27 = vrot.slane %v1559_v30, 4  ;;  %v1532_v1 = vshrl.u32 %v5044_v7, 16  ;;  %v1538_v2 = vshll.u32 %v1316_v16, 16  ;;  %v3747_v28 = vrot.slane %v5017_v11, 9  ;;  %v5082_v58 = vld [vmem:[#allocation2 + $0x6c] sm:$0xf] }
 0x162   : > { %v1524_v29 = vrot.slane %v1522_v3, 5  ;;  %v1530_v33 = vrot.slane %v1528_v44, 5  ;;  %v1843_v56 = vrot.slane %v5029_v24, 5  ;;  %v1846_v6 = vrot.slane %v1319_v53, 5  ;;  %v1322_v5 = vld [vmem:[#allocation2 + $0x74] sm:$0x1] }
 0x163   : > { %v1565_v35 = vsel %vm4865_vm15, %v1560_v27, %v1564_v10  ;;  %v1534_v9 = vrot.slane %v1532_v1, 4  ;;  %v1540_v36 = vrot.slane %v1538_v2, 5  ;;  %v3746_v37 = vrot.slane %v5036_v51, 9 }
 0x164   : > { %v3779_v43 = vcombine.low %v1555_v46, %v1565_v35  ;;  %v1525_v49 = vor.u32 %v1524_v29, %v1521_v21  ;;  %v1844_v32 = vsel %vm4781_vm12, %v3747_v28, %v1843_v56  ;;  %v1845_v25 = vrot.slane %v1843_v56, 4  ;;  %v5103_v56 = vld [vmem:[#allocation2 + $0x90] sm:$0xf] }
 0x165   : > { %v1535_v14 = vor.u32 %v1534_v9, %v1530_v33  ;;  %v1836_v40 = vrot.slane %v5044_v7, 5  ;;  %v1839_v41 = vrot.slane %v1316_v16, 5  ;;  %v1591_v42 = vshrl.u32 %v5064_v62, 16 }
 0x166   : > { %2009 = vrot.lane.b32.xlu1 %v3779_v43, %s4516_s20  ;;  %v1526_v45 = vrot.slane %v1525_v49, 4  ;;  %v1847_v48 = vsel %vm4781_vm12, %v1845_v25, %v1846_v6  ;;  %v1594_v38 = vshll.u32 %v5064_v62, 16  ;;  %v1600_v50 = vshll.u32 %v5069_v39, 16 }
 0x167   : > { %v1536_v53 = vrot.slane %v1535_v14, 4  ;;  %v3795_v54 = vcombine.low %v1844_v32, %v1847_v48  ;;  %v1837_v47 = vsel %vm4781_vm12, %v3746_v37, %v1836_v40  ;;  %v1838_v57 = vrot.slane %v1836_v40, 4 }
 0x168   : > { %v1531_v8 = vsel %vm4865_vm15, %v1526_v45, %v1530_v33  ;;  %v1593_v34 = vrot.slane %v1591_v42, 4  ;;  %v1596_v19 = vrot.slane %v1594_v38, 5  ;;  %v1602_v13 = vrot.slane %v1600_v50, 5  ;;  %v1331_v50 = vld [vmem:[#allocation2 + $0x98] sm:$0x1] }
 0x169   : > { %v1541_v59 = vsel %vm4865_vm15, %v1536_v53, %v1540_v36  ;;  %v1840_v63 = vsel %vm4781_vm12, %v1838_v57, %v1839_v41  ;;  %v1604_v20 = vshrl.u32 %v5069_v39, 16  ;;  %v1610_v4 = vshll.u32 %v1325_v22, 16  ;;  %v5112_v41 = vld [vmem:[#allocation2 + $0x94] sm:$0xf]  ;;  %v5119_v53 = vld [vmem:[#allocation2 + $0x84] sm:$0xf] }
 0x16a   : > { %v3778_v55 = vcombine.low %v1531_v8, %v1541_v59  ;;  %2089 = vrot.lane.b32.xlu1 %v3795_v54, %s4515_s19  ;;  %v3794_v52 = vcombine.low %v1837_v47, %v1840_v63  ;;  %v1597_v12 = vor.u32 %v1596_v19, %v1593_v34  ;;  %v1567_v31 = vshrl.u32 %v5082_v58, 16  ;;  %v5129_v63 = vld [vmem:[#allocation2 + $0x88] sm:$0xf] }
 0x16b   : > { %v1606_v15 = vrot.slane %v1604_v20, 4  ;;  %v1612_v16 = vrot.slane %v1610_v4, 5  ;;  %v1570_v46 = vshll.u32 %v5082_v58, 16  ;;  %v1576_v30 = vshll.u32 %v5086_v61, 16 }
 0x16c   : > { %2007 = vrot.lane.b32.xlu0 %v3778_v55, %s4516_s20  ;;  %v1598_v10 = vrot.slane %v1597_v12, 4  ;;  %v1569_v21 = vrot.slane %v1567_v31, 4  ;;  %v1580_v23 = vshrl.u32 %v5086_v61, 16  ;;  %v1586_v60 = vshll.u32 %v1322_v5, 16  ;;  %v1328_v55 = vld [vmem:[#allocation2 + $0x8c] sm:$0x1] }
 0x16d   : > { %v1607_v3 = vor.u32 %v1606_v15, %v1602_v13  ;;  %v1572_v44 = vrot.slane %v1570_v46, 5  ;;  %v1578_v27 = vrot.slane %v1576_v30, 5  ;;  %v3749_v1 = vrot.slane %v5064_v62, 9 }
 0x16e   : > { %v1603_v2 = vsel %vm4865_vm15, %v1598_v10, %v1602_v13  ;;  %v1582_v28 = vrot.slane %v1580_v23, 4  ;;  %v1588_v29 = vrot.slane %v1586_v60, 5  ;;  %v1857_v33 = vrot.slane %v5069_v39, 5 }
 0x16f   : > { %v1608_v6 = vrot.slane %v1607_v3, 4  ;;  %v1573_v35 = vor.u32 %v1572_v44, %v1569_v21  ;;  %v1860_v9 = vrot.slane %v1325_v22, 5  ;;  %v3748_v36 = vrot.slane %v5082_v58, 9 }
 0x170   : > { %2087 = vrot.lane.b32.xlu0 %v3794_v52, %s4515_s19  ;;  %v1583_v37 = vor.u32 %v1582_v28, %v1578_v27  ;;  %v1858_v43 = vsel %vm4781_vm12, %v3749_v1, %v1857_v33  ;;  %v1859_v49 = vrot.slane %v1857_v33, 4  ;;  %v1850_v32 = vrot.slane %v5086_v61, 5 }
 0x171   : > { %v1613_v25 = vsel %vm4865_vm15, %v1608_v6, %v1612_v16  ;;  %v1574_v14 = vrot.slane %v1573_v35, 4  ;;  %v1853_v40 = vrot.slane %v1322_v5, 5  ;;  %v1639_v42 = vshrl.u32 %v5103_v56, 16 }
 0x172   : > { %v3781_v45 = vcombine.low %v1603_v2, %v1613_v25  ;;  %v1584_v48 = vrot.slane %v1583_v37, 4  ;;  %v1861_v22 = vsel %vm4781_vm12, %v1859_v49, %v1860_v9  ;;  %v1851_v38 = vsel %vm4781_vm12, %v3748_v36, %v1850_v32  ;;  %v5144_v49 = vld [vmem:[#allocation2 + $0xa8] sm:$0xf] }
 0x173   : > { %v1579_v54 = vsel %vm4865_vm15, %v1574_v14, %v1578_v27  ;;  %v3797_v47 = vcombine.low %v1858_v43, %v1861_v22  ;;  %v1852_v57 = vrot.slane %v1850_v32, 4  ;;  %v1641_v8 = vrot.slane %v1639_v42, 4 }
 0x174   : > { %2013 = vrot.lane.b32.xlu1 %v3781_v45, %s4516_s20  ;;  %v1589_v34 = vsel %vm4865_vm15, %v1584_v48, %v1588_v29  ;;  %v1642_v19 = vshll.u32 %v5103_v56, 16  ;;  %v1648_v13 = vshll.u32 %v5112_v41, 16  ;;  %v1652_v59 = vshrl.u32 %v5112_v41, 16 }
 0x175   : > { %v3780_v20 = vcombine.low %v1579_v54, %v1589_v34  ;;  %v1854_v4 = vsel %vm4781_vm12, %v1852_v57, %v1853_v40  ;;  %v1658_v5 = vshll.u32 %v1331_v50, 16  ;;  %v1615_v52 = vshrl.u32 %v5119_v53, 16  ;;  %v1337_v57 = vld [vmem:[#allocation2 + $0xb0] sm:$0x1] }
 0x176   : > { %v3796_v12 = vcombine.low %v1851_v38, %v1854_v4  ;;  %v1644_v31 = vrot.slane %v1642_v19, 5  ;;  %v1650_v15 = vrot.slane %v1648_v13, 5  ;;  %v1654_v16 = vrot.slane %v1652_v59, 4  ;;  %v5154_v38 = vld [vmem:[#allocation2 + $0xac] sm:$0xf] }
 0x177   : > { %2011 = vrot.lane.b32.xlu0 %v3780_v20, %s4516_s20  ;;  %v1660_v46 = vrot.slane %v1658_v5, 5  ;;  %v1617_v30 = vrot.slane %v1615_v52, 4  ;;  %v1618_v10 = vshll.u32 %v5119_v53, 16  ;;  %v1624_v21 = vshll.u32 %v5129_v63, 16  ;;  %v5163_v20 = vld [vmem:[#allocation2 + $0x9c] sm:$0xf] }
 0x178   : > { %2093 = vrot.lane.b32.xlu1 %v3797_v47, %s4515_s19  ;;  %v1645_v23 = vor.u32 %v1644_v31, %v1641_v8  ;;  %v1655_v60 = vor.u32 %v1654_v16, %v1650_v15  ;;  %v1628_v3 = vshrl.u32 %v5129_v63, 16  ;;  %v1634_v44 = vshll.u32 %v1328_v55, 16 }
 0x179   : > { %v1620_v27 = vrot.slane %v1618_v10, 5  ;;  %v1626_v1 = vrot.slane %v1624_v21, 5  ;;  %v3751_v2 = vrot.slane %v5103_v56, 9  ;;  %v1871_v28 = vrot.slane %v5112_v41, 5 }
 0x17a   : > { %v1646_v29 = vrot.slane %v1645_v23, 4  ;;  %v1656_v33 = vrot.slane %v1655_v60, 4  ;;  %v1630_v6 = vrot.slane %v1628_v3, 4  ;;  %v1636_v35 = vrot.slane %v1634_v44, 5 }
 0x17b   : > { %2091 = vrot.lane.b32.xlu0 %v3796_v12, %s4515_s19  ;;  %v1621_v9 = vor.u32 %v1620_v27, %v1617_v30  ;;  %v1872_v36 = vsel %vm4781_vm12, %v3751_v2, %v1871_v28  ;;  %v1873_v37 = vrot.slane %v1871_v28, 4  ;;  %v1874_v43 = vrot.slane %v1331_v50, 5  ;;  %v5169_v12 = vld [vmem:[#allocation2 + $0xa0] sm:$0xf]  ;;  %v1334_v30 = vld [vmem:[#allocation2 + $0xa4] sm:$0x1] }
 0x17c   : > { %v1651_v32 = vsel %vm4865_vm15, %v1646_v29, %v1650_v15  ;;  %v1661_v25 = vsel %vm4865_vm15, %v1656_v33, %v1660_v46  ;;  %v1631_v14 = vor.u32 %v1630_v6, %v1626_v1  ;;  %v3750_v40 = vrot.slane %v5119_v53, 9 }
 0x17d   : > { %v3783_v42 = vcombine.low %v1651_v32, %v1661_v25  ;;  %v1622_v45 = vrot.slane %v1621_v9, 4  ;;  %v1875_v48 = vsel %vm4781_vm12, %v1873_v37, %v1874_v43  ;;  %v1864_v22 = vrot.slane %v5129_v63, 5 }
 0x17e   : > { %v1632_v50 = vrot.slane %v1631_v14, 4  ;;  %v3799_v54 = vcombine.low %v1872_v36, %v1875_v48  ;;  %v1867_v47 = vrot.slane %v1328_v55, 5  ;;  %v1687_v8 = vshrl.u32 %v5144_v49, 16  ;;  %v5185_v48 = vld [vmem:[#allocation2 + $0xb4] sm:$0xf] }
 0x17f   : > { %2017 = vrot.lane.b32.xlu1 %v3783_v42, %s4516_s20  ;;  %v1627_v34 = vsel %vm4865_vm15, %v1622_v45, %v1626_v1  ;;  %v1865_v19 = vsel %vm4781_vm12, %v3750_v40, %v1864_v22  ;;  %v1866_v13 = vrot.slane %v1864_v22, 4  ;;  %v1690_v59 = vshll.u32 %v5144_v49, 16  ;;  %v5187_v22 = vld [vmem:[#allocation2 + $0xb8] sm:$0xf] }
 0x180   : > { %v1637_v4 = vsel %vm4865_vm15, %v1632_v50, %v1636_v35  ;;  %v1689_v5 = vrot.slane %v1687_v8, 4  ;;  %v1696_v55 = vshll.u32 %v5154_v38, 16  ;;  %v1700_v52 = vshrl.u32 %v5154_v38, 16 }
 0x181   : > { %v3782_v31 = vcombine.low %v1627_v34, %v1637_v4  ;;  %v1868_v15 = vsel %vm4781_vm12, %v1866_v13, %v1867_v47  ;;  %v1692_v16 = vrot.slane %v1690_v59, 5  ;;  %v1706_v46 = vshll.u32 %v1337_v57, 16 }
 0x182   : > { %v3798_v10 = vcombine.low %v1865_v19, %v1868_v15  ;;  %v1698_v21 = vrot.slane %v1696_v55, 5  ;;  %v1702_v23 = vrot.slane %v1700_v52, 4  ;;  %v1663_v60 = vshrl.u32 %v5163_v20, 16 }
 0x183   : > { %2015 = vrot.lane.b32.xlu0 %v3782_v31, %s4516_s20  ;;  %2097 = vrot.lane.b32.xlu1 %v3799_v54, %s4515_s19  ;;  %v1693_v3 = vor.u32 %v1692_v16, %v1689_v5  ;;  %v1708_v44 = vrot.slane %v1706_v46, 5  ;;  %v1666_v27 = vshll.u32 %v5163_v20, 16  ;;  %v1672_v1 = vshll.u32 %v5169_v12, 16 }
 0x184   : > { %v1703_v2 = vor.u32 %v1702_v23, %v1698_v21  ;;  %v1665_v28 = vrot.slane %v1663_v60, 4  ;;  %v1676_v29 = vshrl.u32 %v5169_v12, 16  ;;  %v1682_v33 = vshll.u32 %v1334_v30, 16 }
 0x185   : > { %v1694_v6 = vrot.slane %v1693_v3, 4  ;;  %v1668_v35 = vrot.slane %v1666_v27, 5  ;;  %v1674_v9 = vrot.slane %v1672_v1, 5  ;;  %v3753_v36 = vrot.slane %v5144_v49, 9  ;;  %v5211_v1 = vld [vmem:[#allocation2 + $0xc0] sm:$0xf] }
 0x186   : > { %v1704_v37 = vrot.slane %v1703_v2, 4  ;;  %v1678_v43 = vrot.slane %v1676_v29, 4  ;;  %v1684_v32 = vrot.slane %v1682_v33, 5  ;;  %v1885_v25 = vrot.slane %v5154_v38, 5  ;;  %v5213_v2 = vld [vmem:[#allocation2 + $0xc4] sm:$0xf] }
 0x187   : > { %2095 = vrot.lane.b32.xlu0 %v3798_v10, %s4515_s19  ;;  %v1699_v14 = vsel %vm4865_vm15, %v1694_v6, %v1698_v21  ;;  %v1669_v40 = vor.u32 %v1668_v35, %v1665_v28  ;;  %v1888_v42 = vrot.slane %v1337_v57, 5  ;;  %v3752_v45 = vrot.slane %v5163_v20, 9  ;;  %v1340_v57 = vld [vmem:[#allocation2 + $0xbc] sm:$0x1]  ;;  %v1343_v35 = vld [vmem:[#allocation2 + $0xc8] sm:$0x1] }
 0x188   : > { %v1709_v50 = vsel %vm4865_vm15, %v1704_v37, %v1708_v44  ;;  %v1679_v54 = vor.u32 %v1678_v43, %v1674_v9  ;;  %v1886_v47 = vsel %vm4781_vm12, %v3753_v36, %v1885_v25  ;;  %v1887_v8 = vrot.slane %v1885_v25, 4 }
 0x189   : > { %v3785_v34 = vcombine.low %v1699_v14, %v1709_v50  ;;  %v1670_v19 = vrot.slane %v1669_v40, 4  ;;  %v1878_v13 = vrot.slane %v5169_v12, 5  ;;  %v1881_v59 = vrot.slane %v1334_v30, 5 }
 0x18a   : > { %v1680_v4 = vrot.slane %v1679_v54, 4  ;;  %v1889_v5 = vsel %vm4781_vm12, %v1887_v8, %v1888_v42  ;;  %v3754_v55 = vrot.slane %v5185_v48, 9  ;;  %v1892_v52 = vrot.slane %v5187_v22, 5 }
 0x18b   : > { %2021 = vrot.lane.b32.xlu1 %v3785_v34, %s4516_s20  ;;  %v1675_v31 = vsel %vm4865_vm15, %v1670_v19, %v1674_v9  ;;  %v3801_v15 = vcombine.low %v1886_v47, %v1889_v5  ;;  %v1879_v16 = vsel %vm4781_vm12, %v3752_v45, %v1878_v13  ;;  %v1880_v46 = vrot.slane %v1878_v13, 4  ;;  %v5231_v5 = vld [vmem:[#allocation2] sm:$0xf] }
 0x18c   : > { %v1685_v30 = vsel %vm4865_vm15, %v1680_v4, %v1684_v32  ;;  %v1893_v10 = vsel %vm4781_vm12, %v3754_v55, %v1892_v52  ;;  %v1894_v21 = vrot.slane %v1892_v52, 4  ;;  %v1895_v23 = vrot.slane %v1340_v57, 5 }
 0x18d   : > { %v3784_v60 = vcombine.low %v1675_v31, %v1685_v30  ;;  %v1882_v3 = vsel %vm4781_vm12, %v1880_v46, %v1881_v59  ;;  %v1711_v44 = vshrl.u32 %v5185_v48, 16  ;;  %v1714_v27 = vshll.u32 %v5185_v48, 16 }
 0x18e   : > { %v3800_v28 = vcombine.low %v1879_v16, %v1882_v3  ;;  %v1896_v29 = vsel %vm4781_vm12, %v1894_v21, %v1895_v23  ;;  %v1720_v33 = vshll.u32 %v5187_v22, 16  ;;  %v1724_v6 = vshrl.u32 %v5187_v22, 16  ;;  %v5235_v16 = vld [vmem:[#allocation2 + $0x4] sm:$0xf]  ;;  %v1295_v23 = vld [vmem:[#allocation2 + $0x8] sm:$0x1] }
 0x18f   : > { %2019 = vrot.lane.b32.xlu0 %v3784_v60, %s4516_s20  ;;  %2101 = vrot.lane.b32.xlu1 %v3801_v15, %s4515_s19  ;;  %v3802_v9 = vcombine.low %v1893_v10, %v1896_v29  ;;  %v1713_v36 = vrot.slane %v1711_v44, 4  ;;  %v1716_v37 = vrot.slane %v1714_v27, 5  ;;  %v1730_v43 = vshll.u32 %v1340_v57, 16 }
 0x190   : > { %v1722_v32 = vrot.slane %v1720_v33, 5  ;;  %v1726_v25 = vrot.slane %v1724_v6, 4  ;;  %v3803_v14 = vrot.slane %v5211_v1, 9  ;;  %v2217_v40 = vrot.slane %v5213_v2, 5 }
 0x191   : > { %v1717_v42 = vor.u32 %v1716_v37, %v1713_v36  ;;  %v1732_v45 = vrot.slane %v1730_v43, 5  ;;  %v2220_v50 = vrot.slane %v1343_v35, 5  ;;  %v2189_v54 = vshrl.u32 %v5211_v1, 16 }
 0x192   : > { %v1727_v47 = vor.u32 %v1726_v25, %v1722_v32  ;;  %v2218_v8 = vsel %vm4781_vm12, %v3803_v14, %v2217_v40  ;;  %v2219_v34 = vrot.slane %v2217_v40, 4  ;;  %v2192_v19 = vshll.u32 %v5211_v1, 16  ;;  %v4464_v40 = vld [vmem:[%s5734_s3 + $0x4] sm:$0xfc]  }
 0x193   : > { %2099 = vrot.lane.b32.xlu0 %v3800_v28, %s4515_s19  ;;  %2103 = vrot.lane.b32.xlu1 %v3802_v9, %s4515_s19  ;;  %v1718_v13 = vrot.slane %v1717_v42, 4  ;;  %v2191_v59 = vrot.slane %v2189_v54, 4  ;;  %v2198_v57 = vshll.u32 %v5213_v2, 16  ;;  %v2202_v4 = vshrl.u32 %v5213_v2, 16 }
 0x194   : > { %v1728_v55 = vrot.slane %v1727_v47, 4  ;;  %v2221_v52 = vsel %vm4781_vm12, %v2219_v34, %v2220_v50  ;;  %v2194_v31 = vrot.slane %v2192_v19, 5  ;;  %v2208_v15 = vshll.u32 %v1343_v35, 16  ;;  %v4480_v19 = vld [vmem:[#allocation2 + $0xc] sm:$0xf] }
 0x195   : > { %v1723_v46 = vsel %vm4865_vm15, %v1718_v13, %v1722_v32  ;;  %v3806_v30 = vcombine.low %v2218_v8, %v2221_v52  ;;  %v2200_v10 = vrot.slane %v2198_v57, 5  ;;  %v2204_v21 = vrot.slane %v2202_v4, 4  ;;  %v4481_v13 = vld [vmem:[#allocation2 + $0x10] sm:$0xf] }
 0x196   : > { %v1733_v60 = vsel %vm4865_vm15, %v1728_v55, %v1732_v45  ;;  %v2195_v3 = vor.u32 %v2194_v31, %v2191_v59  ;;  %v2210_v44 = vrot.slane %v2208_v15, 5  ;;  %v1351_v27 = vshrl.u32 %v5231_v5, 16  ;;  %v4465_v15 = vld [vmem:[%s5734_s3] sm:$0x3f]  }
 0x197   : > { %v3786_v28 = vcombine.low %v1723_v46, %v1733_v60  ;;  %2233 = vrot.lane.b32.xlu1 %v3806_v30, %s4515_s19  ;;  %v2205_v29 = vor.u32 %v2204_v21, %v2200_v10  ;;  %v1354_v33 = vshll.u32 %v5231_v5, 16  ;;  %v1360_v6 = vshll.u32 %v5235_v16, 16  ;;  %v2076_v30 = vpop.permute.xlu1 %2075 }
 0x198   : > { %v2196_v35 = vrot.slane %v2195_v3, 4  ;;  %v1353_v9 = vrot.slane %v1351_v27, 4  ;;  %v1364_v36 = vshrl.u32 %v5235_v16, 16  ;;  %v1370_v37 = vshll.u32 %v1295_v23, 16 }
 0x199   : > { %2023 = vrot.lane.b32.xlu0 %v3786_v28, %s4516_s20  ;;  %v2206_v43 = vrot.slane %v2205_v29, 4  ;;  %v1356_v32 = vrot.slane %v1354_v33, 5  ;;  %v1362_v25 = vrot.slane %v1360_v6, 5  ;;  %v3739_v14 = vrot.slane %v5231_v5, 9 }
 0x19a   : > { %v2201_v42 = vsel %vm4865_vm15, %v2196_v35, %v2200_v10  ;;  %v1366_v45 = vrot.slane %v1364_v36, 4  ;;  %v1372_v50 = vrot.slane %v1370_v37, 5  ;;  %v1787_v54 = vrot.slane %v5235_v16, 5  ;;  %v1996_v57 = vpop.permute.xlu0 %1995  ;;  %v4482_v35 = vld [vmem:[#allocation2 + $0x18] sm:$0xf] }
 0x19b   : > { %v2211_v47 = vsel %vm4865_vm15, %v2206_v43, %v2210_v44  ;;  %v1357_v8 = vor.u32 %v1356_v32, %v1353_v9  ;;  %v1790_v34 = vrot.slane %v1295_v23, 5  ;;  %v3756_v59 = vcombine.low %v4480_v19, %v4481_v13  ;;  %v4477_v23 = vld [vmem:[%s5734_s3 + $0xc] sm:$0x3f]   ;;  %v4483_v9 = vld [vmem:[#allocation2 + $0x1c] sm:$0xf] }
 0x19c   : > { %v3805_v4 = vcombine.low %v2201_v42, %v2211_v47  ;;  %v1367_v55 = vor.u32 %v1366_v45, %v1362_v25  ;;  %v1788_v52 = vsel %vm4781_vm12, %v3739_v14, %v1787_v54  ;;  %v1789_v31 = vrot.slane %v1787_v54, 4  ;;  %v5287_v14 = vld [vmem:[#allocation2 + $0xcc] sm:$0xf]  ;;  %v5297_v47 = vld [vmem:[#allocation2 + $0xd0] sm:$0xf] }
 0x19d   : > { %v1358_v46 = vrot.slane %v1357_v8, 4  ;;  %v2110_v10 = vsel %vm454_vm1, %v3756_v59, %v1996_v57  ;;  %v2247_v21 = vrot.slane %v4464_v40, 2  ;;  %vm2281_vm2 = vcmask 1045504   ;;  %v2078_v40 = vpop.permute.xlu1 %2077  ;;  %v1346_v8 = vld [vmem:[#allocation2 + $0xd4] sm:$0x1] }
 0x19e   : > { %2228 = vrot.lane.b32.xlu0 %v3805_v4, %s4516_s20  ;;  %v1368_v60 = vrot.slane %v1367_v55, 4  ;;  %v1791_v3 = vsel %vm4781_vm12, %v1789_v31, %v1790_v34  ;;  %v5273_v29 = vsel %vm2153_vm3, %v2110_v10, %v2076_v30  ;;  %v3757_v36 = vcombine.low %v4482_v35, %v4483_v9 }
 0x19f   : > { %v1363_v44 = vsel %vm4865_vm15, %v1358_v46, %v1362_v25  ;;  %v3787_v27 = vcombine.low %v1788_v52, %v1791_v3  ;;  %4432 = vmatprep.subr.msk.bf16.mxu1 %vm2281_vm2, %v2247_v21  ;;  %v2283_v28 = vsel %vm2281_vm2, %v2247_v21, 0  ;;  %4135 = vmatprep.mubr.msk.bf16.mxu1 %vm2248_vm4, %v5273_v29  ;;  %v5282_v37 = vsel %vm2281_vm2, %v4477_v23, 0 }
 0x1a0   : > { %v1373_v33 = vsel %vm4865_vm15, %v1368_v60, %v1372_v50  ;;  %4134 = vmatpush3.bf16.msra.mxu1 %v2283_v28  ;;  %v2454_v32 = vsel %vm2281_vm2, %v4465_v15, 0  ;;  %v3765_v25 = vcombine.low %v5064_v62, %v5069_v39  ;;  %v3764_v45 = vcombine.low %v5082_v58, %v5086_v61 }
 0x1a1   : > { %v3771_v6 = vcombine.low %v1363_v44, %v1373_v33  ;;  %2073 = vrot.lane.b32.xlu1 %v3787_v27, %s4515_s19  ;;  %4433 = vmatprep.subr.msk.bf16.mxu1 %vm2281_vm2, %v4465_v15  ;;  %v1998_v43 = vpop.permute.xlu0 %1997  ;;  %v3767_v50 = vcombine.low %v5103_v56, %v5112_v41  ;;  %v3766_v54 = vcombine.low %v5119_v53, %v5129_v63  ;;  %v2618_v55 = vshrl.u32 %v5287_v14, 16 }
 0x1a2   : > { %v2113_v42 = vsel %vm454_vm1, %v3757_v36, %v1998_v43  ;;  %v3769_v19 = vcombine.low %v5144_v49, %v5154_v38  ;;  %v3768_v13 = vcombine.low %v5163_v20, %v5169_v12  ;;  %v3770_v59 = vcombine.low %v5185_v48, %v5187_v22  ;;  %v2961_v48 = vld [vmem:[%s5736_s5] sm:$0x3] }
 0x1a3   : > { %1993 = vrot.lane.b32.xlu0 %v3771_v6, %s4516_s20  ;;  %v5300_v34 = vsel %vm2153_vm3, %v2113_v42, %v2078_v40  ;;  %v3804_v57 = vcombine.low %v5211_v1, %v5213_v2  ;;  %v3755_v4 = vcombine.low %v5231_v5, %v5235_v16  ;;  %v2621_v52 = vshll.u32 %v5287_v14, 16  ;;  %4435 = vmatprep.subr.msk.bf16.mxu0 %vm503_vm0, %v2961_v48 }
 0x1a4   : > { %4136 = vmatmul.mubr.msk.bf16.vlgmr.msra.gmra.mrb[0].mxu1 %vm2248_vm4, %v5300_v34  ;;  %v2627_v31 = vshll.u32 %v5297_v47, 16  ;;  %v2631_v15 = vshrl.u32 %v5297_v47, 16  ;;  %v2637_v46 = vshll.u32 %v1346_v8, 16  ;;  %v3841_v30 = vrot.slane %v5287_v14, 9 }
 0x1a5   : > { %4168 = vmatpush3.bf16.msra.mxu1 %v2454_v32  ;;  %v2620_v10 = vrot.slane %v2618_v55, 4  ;;  %v2623_v21 = vrot.slane %v2621_v52, 5  ;;  %v2646_v60 = vrot.slane %v5297_v47, 5  ;;  %v2649_v3 = vrot.slane %v1346_v8, 5 }
 0x1a6   : > { %4434 = vmatprep.subr.msk.bf16.mxu1 %vm2281_vm2, %v4477_v23  ;;  %v2629_v44 = vrot.slane %v2627_v31, 5  ;;  %v2633_v27 = vrot.slane %v2631_v15, 4  ;;  %v2639_v9 = vrot.slane %v2637_v46, 5  ;;  %v4484_v31 = vld [vmem:[#allocation2 + $0x24] sm:$0xf]  ;;  %v3842_v5 = vcombine.low %v5287_v14, %v5297_v47 }
 0x1a7   : > { %v2624_v28 = vor.u32 %v2623_v21, %v2620_v10  ;;  %v2647_v33 = vsel %vm4781_vm12, %v3841_v30, %v2646_v60  ;;  %v2648_v6 = vrot.slane %v2646_v60, 4  ;;  %v4485_v15 = vld [vmem:[#allocation2 + $0x28] sm:$0xf]  ;;  %v4487_v30 = vld [vmem:[#allocation2 + $0x34] sm:$0xf] }
 0x1a8   : > { %v2634_v35 = vor.u32 %v2633_v27, %v2629_v44  ;;  %v3758_v46 = vcombine.low %v4484_v31, %v4485_v15  ;;  %v3759_v10 = vcombine.low %v4486_v18, %v4487_v30  ;;  %v3763_v31 = vcombine.low %v5017_v11, %v5029_v24  ;;  %v5500_v14 = vld [vmem:[%s5735_s4] ss:$0 sm:$0xff] }
 0x1a9   : > { %v2625_v36 = vrot.slane %v2624_v28, 4  ;;  %v2650_v43 = vsel %vm4781_vm12, %v2648_v6, %v2649_v3  ;;  %v3760_v6 = vcombine.low %v4978_v17, %v4982_v26 }
 0x1aa   : > { %v2635_v32 = vrot.slane %v2634_v35, 4  ;;  %v3844_v23 = vcombine.low %v2647_v33, %v2650_v43  ;;  %v4488_v35 = vld [vmem:[#allocation2 + $0x48] sm:$0xf] }
 0x1ab   : > { %v2630_v40 = vsel %vm4865_vm15, %v2625_v36, %v2629_v44 }
 0x1ac   : > { %v2640_v42 = vsel %vm4865_vm15, %v2635_v32, %v2639_v9  ;;  %2662 = vrot.lane.b32.xlu1 %v3844_v23, %s4515_s19  ;;  %v2002_v55 = vpop.permute.xlu1 %2001  ;;  %v4489_v9 = vld [vmem:[#allocation2 + $0x4c] sm:$0xf] }
 0x1ad   : > { %v3843_v8 = vcombine.low %v2630_v40, %v2640_v42  ;;  %v2119_v0 = vsel %vm454_vm1, %v3759_v10, %v2002_v55  ;;  %v3761_v36 = vcombine.low %v4488_v35, %v4489_v9  ;;  %v3762_v55 = vcombine.low %v5036_v51, %v5044_v7 }
 0x1af   : > { %2657 = vrot.lane.b32.xlu0 %v3843_v8, %s4516_s20 }
 0x1b0   : > { %v2082_v21 = vpop.permute.xlu1 %2081 }
 0x1b1   : > { %v5337_v27 = vsel %vm2153_vm3, %v2119_v0, %v2082_v21 }
 0x1b2   : > { %v2000_v52 = vpop.permute.xlu0 %1999 }
 0x1b3   : > { %v2116_v60 = vsel %vm454_vm1, %v3758_v46, %v2000_v52 }
 0x1b6   : > { %v2080_v3 = vpop.permute.xlu0 %2079 }
 0x1b7   : > { %v5334_v44 = vsel %vm2153_vm3, %v2116_v60, %v2080_v3 }
 0x1b8   : > { %4139 = vmatprep.mubr.msk.bf16.mxu1 %vm2248_vm4, %v5334_v44 }
 0x1b9   : > { %4140 = vmatmul.mubr.msk.bf16.gmra.mrb[4].mxu1 %vm2248_vm4, %v5337_v27 }
 0x1c2   : > { %v2006_v28 = vpop.permute.xlu1 %2005 }
 0x1c3   : > { %v2125_v40 = vsel %vm454_vm1, %v3761_v36, %v2006_v28 }
 0x1c6   : > { %v2086_v43 = vpop.permute.xlu1 %2085 }
 0x1c7   : > { %v5351_v8 = vsel %vm2153_vm3, %v2125_v40, %v2086_v43 }
 0x1c8   : > { %v2004_v33 = vpop.permute.xlu0 %2003 }
 0x1c9   : > { %v2122_v32 = vsel %vm454_vm1, %v3760_v6, %v2004_v33 }
 0x1cc   : > { %v2084_v23 = vpop.permute.xlu0 %2083 }
 0x1cd   : > { %v5348_v42 = vsel %vm2153_vm3, %v2122_v32, %v2084_v23 }
 0x1ce   : > { %4143 = vmatprep.mubr.msk.bf16.mxu1 %vm2248_vm4, %v5348_v42 }
 0x1cf   : > { %4144 = vmatmul.mubr.msk.bf16.gmra.mrb[8].mxu1 %vm2248_vm4, %v5351_v8 }
 0x1d8   : > { %v2010_v17 = vpop.permute.xlu1 %2009 }
 0x1d9   : > { %v2131_v18 = vsel %vm454_vm1, %v3763_v31, %v2010_v17 }
 0x1dc   : > { %v2090_v52 = vpop.permute.xlu1 %2089 }
 0x1dd   : > { %v5367_v10 = vsel %vm2153_vm3, %v2131_v18, %v2090_v52 }
 0x1de   : > { %v2008_v26 = vpop.permute.xlu0 %2007 }
 0x1df   : > { %v2128_v15 = vsel %vm454_vm1, %v3762_v55, %v2008_v26 }
 0x1e2   : > { %v2088_v46 = vpop.permute.xlu0 %2087 }
 0x1e3   : > { %v5364_v30 = vsel %vm2153_vm3, %v2128_v15, %v2088_v46 }
 0x1e4   : > { %4147 = vmatprep.mubr.msk.bf16.mxu1 %vm2248_vm4, %v5364_v30 }
 0x1e5   : > { %4148 = vmatmul.mubr.msk.bf16.gmra.mrb[12].mxu1 %vm2248_vm4, %v5367_v10 }
 0x1e6   : > { %v2014_v51 = vpop.permute.xlu1 %2013 }
 0x1e7   : > { %v2137_v60 = vsel %vm454_vm1, %v3765_v25, %v2014_v51 }
 0x1e9   : > { %v2012_v7 = vpop.permute.xlu0 %2011 }
 0x1ea   : > { %v2094_v11 = vpop.permute.xlu1 %2093  ;;  %v2134_v24 = vsel %vm454_vm1, %v3764_v45, %v2012_v7 }
 0x1eb   : > { %v5385_v0 = vsel %vm2153_vm3, %v2137_v60, %v2094_v11 }
 0x1ed   : > { %v2092_v21 = vpop.permute.xlu0 %2091 }
 0x1ee   : > { %v5382_v3 = vsel %vm2153_vm3, %v2134_v24, %v2092_v21 }
 0x1ef   : > { %4151 = vmatprep.mubr.msk.bf16.mxu1 %vm2248_vm4, %v5382_v3 }
 0x1f0   : > { %4152 = vmatmul.mubr.msk.bf16.gmra.mrb[16].mxu1 %vm2248_vm4, %v5385_v0 }
 0x1f1   : > { %v2018_v58 = vpop.permute.xlu1 %2017 }
 0x1f2   : > { %v2143_v25 = vsel %vm454_vm1, %v3767_v50, %v2018_v58 }
 0x1f5   : > { %v2016_v61 = vpop.permute.xlu0 %2015  ;;  %v2098_v45 = vpop.permute.xlu1 %2097 }
 0x1f6   : > { %v2140_v62 = vsel %vm454_vm1, %v3766_v54, %v2016_v61  ;;  %v2179_v33 = vsel %vm2153_vm3, %v2143_v25, %v2098_v45 }
 0x1f9   : > { %v2096_v39 = vpop.permute.xlu0 %2095 }
 0x1fa   : > { %v2177_v28 = vsel %vm2153_vm3, %v2140_v62, %v2096_v39 }
 0x1fb   : > { %4155 = vmatprep.mubr.msk.bf16.mxu1 %vm2248_vm4, %v2177_v28 }
 0x1fc   : > { %4156 = vmatmul.mubr.msk.bf16.gmra.mrb[20].mxu1 %vm2248_vm4, %v2179_v33 }
 0x1fd   : > { %v2022_v6 = vpop.permute.xlu1 %2021 }
 0x1fe   : > { %v2149_v56 = vsel %vm454_vm1, %v3769_v19, %v2022_v6 }
 0x201   : > { %v2020_v35 = vpop.permute.xlu0 %2019  ;;  %v2102_v9 = vpop.permute.xlu1 %2101 }
 0x202   : > { %v2146_v53 = vsel %vm454_vm1, %v3768_v13, %v2020_v35  ;;  %v2183_v50 = vsel %vm2153_vm3, %v2149_v56, %v2102_v9 }
 0x205   : > { %v2100_v63 = vpop.permute.xlu0 %2099  ;;  %v2104_v54 = vpop.permute.xlu1 %2103 }
 0x206   : > { %v2181_v41 = vsel %vm2153_vm3, %v2146_v53, %v2100_v63 }
 0x207   : > { %4159 = vmatprep.mubr.msk.bf16.mxu1 %vm2248_vm4, %v2181_v41 }
 0x208   : > { %4160 = vmatmul.mubr.msk.bf16.gmra.mrb[24].mxu1 %vm2248_vm4, %v2183_v50 }
 0x209   : > { %v2234_v49 = vpop.permute.xlu1 %2233 }
 0x20b   : > { %v2024_v36 = vpop.permute.xlu0 %2023 }
 0x20c   : > { %v2152_v20 = vsel %vm454_vm1, %v3770_v59, %v2024_v36  ;;  %v3018_v59 = vsel %vm503_vm0, %v2961_v48, 0 }
 0x20d   : > { %v2185_v12 = vsel %vm2153_vm3, %v2152_v20, %v2104_v54  ;;  %4236 = vmatpush3.bf16.msra.mxu0 %v3018_v59 }
 0x20e   : > { %4163 = vmatprep.mubr.msk.bf16.mxu1 %vm2248_vm4, %v2185_v12 }
 0x210   : > { %v2229_v38 = vpop.permute.xlu0 %2228 }
 0x211   : > { %v2237_v19 = vsel %vm454_vm1, %v3804_v57, %v2229_v38  ;;  %v3181_v57 = vld [vmem:[%s5738_s7] sm:$0x3] }
 0x212   : > { %v2239_v13 = vsel %vm2153_vm3, %v2237_v19, %v2234_v49  ;;  %4436 = vmatprep.subr.msk.bf16.mxu0 %vm503_vm0, %v3181_v57 }
 0x213   : > { %4164 = vmatmul.mubr.msk.bf16.gmra.mrb[28].mxu1 %vm2248_vm4, %v2239_v13  ;;  %v2074_v22 = vpop.permute.xlu1 %2073 }
 0x215   : > { %v1994_v43 = vpop.permute.xlu0 %1993 }
 0x216   : > { %v2107_v1 = vsel %vm454_vm1, %v3755_v4, %v1994_v43 }
 0x217   : > { %v2155_v2 = vsel %vm2153_vm3, %v2107_v1, %v2074_v22 }
 0x218   : > { %4169 = vmatprep.mubr.msk.bf16.mxu1 %vm2248_vm4, %v2155_v2 }
 0x21b   : > { %4170 = vmatmul.mubr.msk.bf16.vlgmr.msra.gmra.mrb[0].mxu1 %vm2248_vm4, %v5273_v29 }
 0x21c   : > { %4202 = vmatpush3.bf16.msra.mxu1 %v5282_v37  ;;  %4173 = vmatprep.mubr.msk.bf16.mxu1 %vm2248_vm4, %v5300_v34 }
 0x21e   : > { %v2663_v37 = vpop.permute.xlu1 %2662 }
 0x221   : > { %v2658_v16 = vpop.permute.xlu0 %2657 }
 0x222   : > { %v2666_v29 = vsel %vm454_vm1, %v3842_v5, %v2658_v16 }
 0x223   : > { %4174 = vmatmul.mubr.msk.bf16.gmra.mrb[4].mxu1 %vm2248_vm4, %v5334_v44 }
 0x224   : > { %4177 = vmatprep.mubr.msk.bf16.mxu1 %vm2248_vm4, %v5337_v27 }
 0x22b   : > { %4178 = vmatmul.mubr.msk.bf16.gmra.mrb[8].mxu1 %vm2248_vm4, %v5348_v42 }
 0x22c   : > { %4181 = vmatprep.mubr.msk.bf16.mxu1 %vm2248_vm4, %v5351_v8 }
 0x233   : > { %4182 = vmatmul.mubr.msk.bf16.gmra.mrb[12].mxu1 %vm2248_vm4, %v5364_v30 }
 0x234   : > { %4185 = vmatprep.mubr.msk.bf16.mxu1 %vm2248_vm4, %v5367_v10 }
 0x23b   : > { %4186 = vmatmul.mubr.msk.bf16.gmra.mrb[16].mxu1 %vm2248_vm4, %v5382_v3 }
 0x23c   : > { %4189 = vmatprep.mubr.msk.bf16.mxu1 %vm2248_vm4, %v5385_v0 }
 0x243   : > { %4190 = vmatmul.mubr.msk.bf16.gmra.mrb[20].mxu1 %vm2248_vm4, %v2177_v28 }
 0x244   : > { %4193 = vmatprep.mubr.msk.bf16.mxu1 %vm2248_vm4, %v2179_v33 }
 0x24b   : > { %4194 = vmatmul.mubr.msk.bf16.gmra.mrb[24].mxu1 %vm2248_vm4, %v2181_v41 }
 0x24c   : > { %4197 = vmatprep.mubr.msk.bf16.mxu1 %vm2248_vm4, %v2183_v50 }
 0x253   : > { %4198 = vmatmul.mubr.msk.bf16.gmra.mrb[28].mxu1 %vm2248_vm4, %v2185_v12 }
 0x254   : > { %4203 = vmatprep.mubr.msk.bf16.mxu1 %vm2248_vm4, %v5300_v34  ;;  %v2668_v34 = vsel %vm2153_vm3, %v2666_v29, %v2663_v37 }
 0x25b   : > { %4204 = vmatmul.mubr.msk.bf16.vlgmr.msra.gmra.mrb[0].mxu1 %vm2248_vm4, %v5334_v44 }
 0x25c   : > { %4207 = vmatprep.mubr.msk.bf16.mxu1 %vm2248_vm4, %v5337_v27 }
 0x263   : > { %4208 = vmatmul.mubr.msk.bf16.gmra.mrb[4].mxu1 %vm2248_vm4, %v5348_v42 }
 0x264   : > { %4211 = vmatprep.mubr.msk.bf16.mxu1 %vm2248_vm4, %v5351_v8 }
 0x26b   : > { %4212 = vmatmul.mubr.msk.bf16.gmra.mrb[8].mxu1 %vm2248_vm4, %v5364_v30  ;;  %v3183_v30 = vsel %vm503_vm0, %v3181_v57, 0  ;;  %vm3577_vm0 = vcmask 125952  }
 0x26c   : > { %4215 = vmatprep.mubr.msk.bf16.mxu1 %vm2248_vm4, %v5367_v10 }
 0x273   : > { %4216 = vmatmul.mubr.msk.bf16.gmra.mrb[12].mxu1 %vm2248_vm4, %v5382_v3 }
 0x274   : > { %4219 = vmatprep.mubr.msk.bf16.mxu1 %vm2248_vm4, %v5385_v0 }
 0x27b   : > { %4220 = vmatmul.mubr.msk.bf16.gmra.mrb[16].mxu1 %vm2248_vm4, %v2177_v28 }
 0x27c   : > { %4223 = vmatprep.mubr.msk.bf16.mxu1 %vm2248_vm4, %v2179_v33 }
 0x283   : > { %4224 = vmatmul.mubr.msk.bf16.gmra.mrb[20].mxu1 %vm2248_vm4, %v2181_v41 }
 0x284   : > { %4227 = vmatprep.mubr.msk.bf16.mxu1 %vm2248_vm4, %v2183_v50 }
 0x28b   : > { %4228 = vmatmul.mubr.msk.bf16.gmra.mrb[24].mxu1 %vm2248_vm4, %v2185_v12 }
 0x28c   : > { %4231 = vmatprep.mubr.msk.bf16.mxu1 %vm2248_vm4, %v2239_v13 }
 0x293   : > { %4232 = vmatmul.mubr.msk.bf16.gmra.mrb[28].mxu1 %vm2248_vm4, %v2668_v34 }
 0x32e   : > { %v4205_v47 = vpop.f32.mrb[0].mxu1 }
 0x32f   : > { %v2883_v4 = vadd.f32 %v4205_v47, %v5500_v14  ;;  %v2715_v44 = vpop.f32.mrb[1].mxu1 }
 0x330   : > { %v2881_v27 = vadd.f32 %v5500_v14, %v2715_v44  ;;  %v4206_v32 = vpop.f32.mrb[2].mxu1 }
 0x331   : > { %v2884_v23 = vadd.f32 %v4206_v32, %v5500_v14  ;;  %v2718_v40 = vpop.f32.mrb[3].mxu1  ;;  %v2915_v8 = vmax.f32 %v2883_v4, 0.0 }
 0x332   : > { %v2882_v42 = vadd.f32 %v5500_v14, %v2718_v40  ;;  %v2913_v26 = vmax.f32 %v2881_v27, 0.0 }
 0x333   : > { %v2916_v17 = vmax.f32 %v2884_v23, 0.0 }
 0x334   : > { %v2914_v55 = vmax.f32 %v2882_v42, 0.0 }
 0x335   : > { %v2946_v52 = vpack.c.bf16 %v2916_v17, %v2915_v8 }
 0x336   : > { %v2945_v31 = vpack.c.bf16 %v2914_v55, %v2913_v26  ;;  %v4209_v15 = vpop.f32.mrb[4].mxu1 }
 0x337   : > { %v2887_v46 = vadd.f32 %v4209_v15, %v5500_v14  ;;  %v2731_v18 = vpop.f32.mrb[5].mxu1 }
 0x338   : > { %v2885_v10 = vadd.f32 %v5500_v14, %v2731_v18  ;;  %v4210_v51 = vpop.f32.mrb[6].mxu1  ;;  %4237 = vmatprep.mubr.msk.bf16.mxu0 %vm454_vm1, %v2945_v31 }
 0x339   : > { %v2888_v7 = vadd.f32 %v4210_v51, %v5500_v14  ;;  %v2734_v11 = vpop.f32.mrb[7].mxu1  ;;  %4238 = vmatmul.mubr.msk.bf16.vlgmr.msra.gmra.mrb[32].mxu0 %vm454_vm1, %v2946_v52  ;;  %v2919_v21 = vmax.f32 %v2887_v46, 0.0 }
 0x33a   : > { %v2886_v24 = vadd.f32 %v5500_v14, %v2734_v11  ;;  %4270 = vmatpush3.bf16.msra.mxu0 %v3183_v30  ;;  %v2917_v3 = vmax.f32 %v2885_v10, 0.0 }
 0x33b   : > { %v2920_v60 = vmax.f32 %v2888_v7, 0.0 }
 0x33c   : > { %v2918_v0 = vmax.f32 %v2886_v24, 0.0 }
 0x33d   : > { %v2948_v58 = vpack.c.bf16 %v2920_v60, %v2919_v21 }
 0x33e   : > { %v2947_v61 = vpack.c.bf16 %v2918_v0, %v2917_v3  ;;  %v4213_v45 = vpop.f32.mrb[8].mxu1 }
 0x33f   : > { %v2891_v62 = vadd.f32 %v4213_v45, %v5500_v14  ;;  %v2747_v39 = vpop.f32.mrb[9].mxu1 }
 0x340   : > { %v2889_v25 = vadd.f32 %v5500_v14, %v2747_v39  ;;  %v4214_v28 = vpop.f32.mrb[10].mxu1  ;;  %4241 = vmatprep.mubr.msk.bf16.mxu0 %vm454_vm1, %v2947_v61 }
 0x341   : > { %v2892_v33 = vadd.f32 %v4214_v28, %v5500_v14  ;;  %v2750_v6 = vpop.f32.mrb[11].mxu1  ;;  %4242 = vmatmul.mubr.msk.bf16.gmra.mrb[36].mxu0 %vm454_vm1, %v2948_v58  ;;  %v2923_v9 = vmax.f32 %v2891_v62, 0.0 }
 0x342   : > { %v2890_v35 = vadd.f32 %v5500_v14, %v2750_v6  ;;  %v2921_v63 = vmax.f32 %v2889_v25, 0.0 }
 0x343   : > { %v2924_v53 = vmax.f32 %v2892_v33, 0.0 }
 0x344   : > { %v2922_v56 = vmax.f32 %v2890_v35, 0.0 }
 0x345   : > { %v2950_v41 = vpack.c.bf16 %v2924_v53, %v2923_v9 }
 0x346   : > { %v2949_v50 = vpack.c.bf16 %v2922_v56, %v2921_v63  ;;  %v4217_v54 = vpop.f32.mrb[12].mxu1 }
 0x347   : > { %v2895_v36 = vadd.f32 %v4217_v54, %v5500_v14  ;;  %v2763_v20 = vpop.f32.mrb[13].mxu1 }
 0x348   : > { %v2893_v12 = vadd.f32 %v5500_v14, %v2763_v20  ;;  %v4218_v49 = vpop.f32.mrb[14].mxu1  ;;  %4245 = vmatprep.mubr.msk.bf16.mxu0 %vm454_vm1, %v2949_v50 }
 0x349   : > { %v2896_v38 = vadd.f32 %v4218_v49, %v5500_v14  ;;  %v2766_v19 = vpop.f32.mrb[15].mxu1  ;;  %4246 = vmatmul.mubr.msk.bf16.gmra.mrb[40].mxu0 %vm454_vm1, %v2950_v41  ;;  %v2927_v48 = vmax.f32 %v2895_v36, 0.0 }
 0x34a   : > { %v2894_v13 = vadd.f32 %v5500_v14, %v2766_v19  ;;  %v2925_v59 = vmax.f32 %v2893_v12, 0.0 }
 0x34b   : > { %v2928_v22 = vmax.f32 %v2896_v38, 0.0 }
 0x34c   : > { %v2926_v43 = vmax.f32 %v2894_v13, 0.0  ;;  %v4490_v13 = vld [vmem:[%s4588_s16] sm:$0xff]  }
 0x34d   : > { %v2952_v1 = vpack.c.bf16 %v2928_v22, %v2927_v48  ;;  %v4491_v48 = vld [vmem:[%s4588_s16 + $0x8] sm:$0xff]   ;;  %v4493_v22 = vld [vmem:[%s4588_s16 + $0x18] sm:$0xff]  }
 0x34e   : > { %v2951_v2 = vpack.c.bf16 %v2926_v43, %v2925_v59  ;;  %v4221_v5 = vpop.f32.mrb[16].mxu1  ;;  %v4494_v59 = vld [vmem:[%s4588_s16 + $0x20] sm:$0xff]   ;;  %v4495_v43 = vld [vmem:[%s4588_s16 + $0x28] sm:$0xff]  }
 0x34f   : > { %v2899_v16 = vadd.f32 %v4221_v5, %v5500_v14  ;;  %v2779_v29 = vpop.f32.mrb[17].mxu1  ;;  %v4498_v5 = vld [vmem:[%s4588_s16 + $0x40] sm:$0xff]  }
 0x350   : > { %v2897_v37 = vadd.f32 %v5500_v14, %v2779_v29  ;;  %v4222_v34 = vpop.f32.mrb[18].mxu1  ;;  %4249 = vmatprep.mubr.msk.bf16.mxu0 %vm454_vm1, %v2951_v2  ;;  %v4497_v2 = vld [vmem:[%s4588_s16 + $0x38] sm:$0xff]   ;;  %v4500_v29 = vld [vmem:[%s4588_s16 + $0x50] sm:$0xff]  }
 0x351   : > { %v2900_v57 = vadd.f32 %v4222_v34, %v5500_v14  ;;  %v2782_v47 = vpop.f32.mrb[19].mxu1  ;;  %4250 = vmatmul.mubr.msk.bf16.gmra.mrb[44].mxu0 %vm454_vm1, %v2952_v1  ;;  %v2931_v44 = vmax.f32 %v2899_v16, 0.0  ;;  %v4496_v1 = vld [vmem:[%s4588_s16 + $0x30] sm:$0xff]   ;;  %v4499_v16 = vld [vmem:[%s4588_s16 + $0x48] sm:$0xff]   ;;  %v4502_v34 = vld [vmem:[%s4588_s16 + $0x60] sm:$0xff]  }
 0x352   : > { %v2898_v4 = vadd.f32 %v5500_v14, %v2782_v47  ;;  %v2929_v32 = vmax.f32 %v2897_v37, 0.0  ;;  %v4501_v37 = vld [vmem:[%s4588_s16 + $0x58] sm:$0xff]   ;;  %v4504_v47 = vld [vmem:[%s4588_s16 + $0x70] sm:$0xff]  }
 0x353   : > { %v2932_v27 = vmax.f32 %v2900_v57, 0.0  ;;  %v4503_v57 = vld [vmem:[%s4588_s16 + $0x68] sm:$0xff]  }
 0x354   : > { %v2930_v23 = vmax.f32 %v2898_v4, 0.0  ;;  %v4505_v4 = vld [vmem:[%s4588_s16 + $0x78] sm:$0xff]  }
 0x355   : > { %v2954_v40 = vpack.c.bf16 %v2932_v27, %v2931_v44  ;;  %v5586_v44 = vld [vmem:[%s5737_s6] ss:$0 sm:$0xff] }
 0x356   : > { %v2953_v42 = vpack.c.bf16 %v2930_v23, %v2929_v32  ;;  %v4225_v8 = vpop.f32.mrb[20].mxu1  ;;  %v5591_v32 = vld [vmem:[%s5739_s8] ss:$0 sm:$0xff] }
 0x357   : > { %v2903_v17 = vadd.f32 %v4225_v8, %v5500_v14  ;;  %v2795_v26 = vpop.f32.mrb[21].mxu1 }
 0x358   : > { %v2901_v55 = vadd.f32 %v5500_v14, %v2795_v26  ;;  %v4226_v52 = vpop.f32.mrb[22].mxu1  ;;  %4253 = vmatprep.mubr.msk.bf16.mxu0 %vm454_vm1, %v2953_v42 }
 0x359   : > { %v2904_v31 = vadd.f32 %v4226_v52, %v5500_v14  ;;  %v2798_v15 = vpop.f32.mrb[23].mxu1  ;;  %4254 = vmatmul.mubr.msk.bf16.gmra.mrb[48].mxu0 %vm454_vm1, %v2954_v40  ;;  %v2935_v18 = vmax.f32 %v2903_v17, 0.0 }
 0x35a   : > { %v2902_v46 = vadd.f32 %v5500_v14, %v2798_v15  ;;  %v2933_v10 = vmax.f32 %v2901_v55, 0.0 }
 0x35b   : > { %v2936_v30 = vmax.f32 %v2904_v31, 0.0 }
 0x35c   : > { %v2934_v51 = vmax.f32 %v2902_v46, 0.0 }
 0x35d   : > { %v2956_v7 = vpack.c.bf16 %v2936_v30, %v2935_v18 }
 0x35e   : > { %v2955_v11 = vpack.c.bf16 %v2934_v51, %v2933_v10  ;;  %v4229_v24 = vpop.f32.mrb[24].mxu1 }
 0x35f   : > { %v2907_v21 = vadd.f32 %v4229_v24, %v5500_v14  ;;  %v2811_v60 = vpop.f32.mrb[25].mxu1 }
 0x360   : > { %v2905_v3 = vadd.f32 %v5500_v14, %v2811_v60  ;;  %v4230_v0 = vpop.f32.mrb[26].mxu1  ;;  %4257 = vmatprep.mubr.msk.bf16.mxu0 %vm454_vm1, %v2955_v11 }
 0x361   : > { %v2908_v58 = vadd.f32 %v4230_v0, %v5500_v14  ;;  %v2814_v61 = vpop.f32.mrb[27].mxu1  ;;  %4258 = vmatmul.mubr.msk.bf16.gmra.mrb[52].mxu0 %vm454_vm1, %v2956_v7  ;;  %v2939_v62 = vmax.f32 %v2907_v21, 0.0 }
 0x362   : > { %v2906_v45 = vadd.f32 %v5500_v14, %v2814_v61  ;;  %v2937_v25 = vmax.f32 %v2905_v3, 0.0 }
 0x363   : > { %v2940_v39 = vmax.f32 %v2908_v58, 0.0 }
 0x364   : > { %v2938_v28 = vmax.f32 %v2906_v45, 0.0 }
 0x365   : > { %v2958_v33 = vpack.c.bf16 %v2940_v39, %v2939_v62 }
 0x366   : > { %v2957_v6 = vpack.c.bf16 %v2938_v28, %v2937_v25  ;;  %v4233_v35 = vpop.f32.mrb[28].mxu1 }
 0x367   : > { %v2911_v9 = vadd.f32 %v4233_v35, %v5500_v14  ;;  %v2827_v53 = vpop.f32.mrb[29].mxu1 }
 0x368   : > { %v2909_v63 = vadd.f32 %v5500_v14, %v2827_v53  ;;  %v4234_v56 = vpop.f32.mrb[30].mxu1  ;;  %4261 = vmatprep.mubr.msk.bf16.mxu0 %vm454_vm1, %v2957_v6 }
 0x369   : > { %v2912_v41 = vadd.f32 %v4234_v56, %v5500_v14  ;;  %v2830_v50 = vpop.f32.mrb[31].mxu1  ;;  %4262 = vmatmul.mubr.msk.bf16.gmra.mrb[56].mxu0 %vm454_vm1, %v2958_v33  ;;  %v2943_v36 = vmax.f32 %v2911_v9, 0.0 }
 0x36a   : > { %v2910_v54 = vadd.f32 %v5500_v14, %v2830_v50  ;;  %v2941_v12 = vmax.f32 %v2909_v63, 0.0  ;;  %v4492_v14 = vld [vmem:[%s4588_s16 + $0x10] sm:$0xff]  }
 0x36b   : > { %v2944_v20 = vmax.f32 %v2912_v41, 0.0 }
 0x36c   : > { %v2942_v49 = vmax.f32 %v2910_v54, 0.0 }
 0x36d   : > { %v2960_v38 = vpack.c.bf16 %v2944_v20, %v2943_v36 }
 0x36e   : > { %v2959_v19 = vpack.c.bf16 %v2942_v49, %v2941_v12 }
 0x370   : > { %4265 = vmatprep.mubr.msk.bf16.mxu0 %vm454_vm1, %v2959_v19 }
 0x371   : > { %4266 = vmatmul.mubr.msk.bf16.gmra.mrb[60].mxu0 %vm454_vm1, %v2960_v38 }
 0x372   : > { %4271 = vmatprep.mubr.msk.bf16.mxu0 %vm454_vm1, %v4490_v13 }
 0x379   : > { %4272 = vmatmul.mubr.msk.bf16.vlgmr.msra.gmra.mrb[32].mxu0 %vm454_vm1, %v4491_v48 }
 0x37a   : > { %4275 = vmatprep.mubr.msk.bf16.mxu0 %vm454_vm1, %v4492_v14 }
 0x381   : > { %4276 = vmatmul.mubr.msk.bf16.gmra.mrb[36].mxu0 %vm454_vm1, %v4493_v22 }
 0x382   : > { %4279 = vmatprep.mubr.msk.bf16.mxu0 %vm454_vm1, %v4494_v59 }
 0x389   : > { %4280 = vmatmul.mubr.msk.bf16.gmra.mrb[40].mxu0 %vm454_vm1, %v4495_v43 }
 0x38a   : > { %4283 = vmatprep.mubr.msk.bf16.mxu0 %vm454_vm1, %v4496_v1 }
 0x391   : > { %4284 = vmatmul.mubr.msk.bf16.gmra.mrb[44].mxu0 %vm454_vm1, %v4497_v2 }
 0x392   : > { %4287 = vmatprep.mubr.msk.bf16.mxu0 %vm454_vm1, %v4498_v5 }
 0x399   : > { %4288 = vmatmul.mubr.msk.bf16.gmra.mrb[48].mxu0 %vm454_vm1, %v4499_v16 }
 0x39a   : > { %4291 = vmatprep.mubr.msk.bf16.mxu0 %vm454_vm1, %v4500_v29 }
 0x3a1   : > { %4292 = vmatmul.mubr.msk.bf16.gmra.mrb[52].mxu0 %vm454_vm1, %v4501_v37 }
 0x3a2   : > { %4295 = vmatprep.mubr.msk.bf16.mxu0 %vm454_vm1, %v4502_v34 }
 0x3a9   : > { %4296 = vmatmul.mubr.msk.bf16.gmra.mrb[56].mxu0 %vm454_vm1, %v4503_v57 }
 0x3aa   : > { %4299 = vmatprep.mubr.msk.bf16.mxu0 %vm454_vm1, %v4504_v47 }
 0x3b1   : > { %4300 = vmatmul.mubr.msk.bf16.gmra.mrb[60].mxu0 %vm454_vm1, %v4505_v4 }
 0x44c   : > { %v4273_v27 = vpop.f32.mrb[32].mxu0 }
 0x44d   : > { %v4303_v23 = vadd.f32 %v4273_v27, %v5586_v44  ;;  %v3219_v40 = vpop.f32.mrb[33].mxu0 }
 0x44e   : > { %v4304_v42 = vadd.f32 %v5586_v44, %v3219_v40  ;;  %v4274_v8 = vpop.f32.mrb[34].mxu0 }
 0x44f   : > { %v3387_v17 = vadd.f32 %v4303_v23, %v5591_v32  ;;  %v4305_v26 = vadd.f32 %v4274_v8, %v5586_v44  ;;  %v3222_v55 = vpop.f32.mrb[35].mxu0 }
 0x450   : > { %v3385_v52 = vadd.f32 %v4304_v42, %v5591_v32  ;;  %v4306_v31 = vadd.f32 %v5586_v44, %v3222_v55 }
 0x451   : > { %v3419_v15 = vmax.f32 %v3387_v17, 0.0  ;;  %v3388_v46 = vadd.f32 %v4305_v26, %v5591_v32 }
 0x452   : > { %v3417_v18 = vmax.f32 %v3385_v52, 0.0  ;;  %v3386_v30 = vadd.f32 %v4306_v31, %v5591_v32 }
 0x453   : > { %v3967_v10 = vpack.c.bf16 %v3419_v15, %v3419_v15  ;;  %v3420_v51 = vmax.f32 %v3388_v46, 0.0 }
 0x454   : > { %v3965_v7 = vpack.c.bf16 %v3417_v18, %v3417_v18  ;;  %v3418_v11 = vmax.f32 %v3386_v30, 0.0  ;;  %v4277_v24 = vpop.f32.mrb[36].mxu0 }
 0x455   : > { %3580 = vst.msk [vmem:[%s5605_s23 + $0x8] sm:$0xf] %vm3577_vm0, %v3967_v10  ;;  %v3968_v21 = vpack.c.bf16 %v3420_v51, %v3420_v51  ;;  %v4307_v60 = vadd.f32 %v4277_v24, %v5586_v44  ;;  %v3235_v3 = vpop.f32.mrb[37].mxu0 }
 0x456   : > { %3578 = vst.msk [vmem:[%s5605_s23] sm:$0xf] %vm3577_vm0, %v3965_v7  ;;  %v3966_v0 = vpack.c.bf16 %v3418_v11, %v3418_v11  ;;  %v4308_v58 = vadd.f32 %v5586_v44, %v3235_v3  ;;  %v4278_v61 = vpop.f32.mrb[38].mxu0 }
 0x457   : > { %3581 = vst.msk [vmem:[%s5605_s23 + $0xc] sm:$0xf] %vm3577_vm0, %v3968_v21  ;;  %v3391_v45 = vadd.f32 %v4307_v60, %v5591_v32  ;;  %v4309_v62 = vadd.f32 %v4278_v61, %v5586_v44  ;;  %v3238_v39 = vpop.f32.mrb[39].mxu0 }
 0x458   : > { %3579 = vst.msk [vmem:[%s5605_s23 + $0x4] sm:$0xf] %vm3577_vm0, %v3966_v0  ;;  %v3389_v25 = vadd.f32 %v4308_v58, %v5591_v32  ;;  %v4310_v28 = vadd.f32 %v5586_v44, %v3238_v39 }
 0x459   : > { %v3423_v33 = vmax.f32 %v3391_v45, 0.0  ;;  %v3392_v6 = vadd.f32 %v4309_v62, %v5591_v32 }
 0x45a   : > { %v3421_v35 = vmax.f32 %v3389_v25, 0.0  ;;  %v3390_v9 = vadd.f32 %v4310_v28, %v5591_v32 }
 0x45b   : > { %v3971_v53 = vpack.c.bf16 %v3423_v33, %v3423_v33  ;;  %v3424_v63 = vmax.f32 %v3392_v6, 0.0 }
 0x45c   : > { %v3969_v56 = vpack.c.bf16 %v3421_v35, %v3421_v35  ;;  %v3422_v41 = vmax.f32 %v3390_v9, 0.0  ;;  %v4281_v50 = vpop.f32.mrb[40].mxu0 }
 0x45d   : > { %3584 = vst.msk [vmem:[%s5605_s23 + $0x18] sm:$0xf] %vm3577_vm0, %v3971_v53  ;;  %v3972_v54 = vpack.c.bf16 %v3424_v63, %v3424_v63  ;;  %v4311_v36 = vadd.f32 %v4281_v50, %v5586_v44  ;;  %v3251_v20 = vpop.f32.mrb[41].mxu0 }
 0x45e   : > { %3582 = vst.msk [vmem:[%s5605_s23 + $0x10] sm:$0xf] %vm3577_vm0, %v3969_v56  ;;  %v3970_v12 = vpack.c.bf16 %v3422_v41, %v3422_v41  ;;  %v4312_v49 = vadd.f32 %v5586_v44, %v3251_v20  ;;  %v4282_v38 = vpop.f32.mrb[42].mxu0 }
 0x45f   : > { %3585 = vst.msk [vmem:[%s5605_s23 + $0x1c] sm:$0xf] %vm3577_vm0, %v3972_v54  ;;  %v3395_v19 = vadd.f32 %v4311_v36, %v5591_v32  ;;  %v4313_v13 = vadd.f32 %v4282_v38, %v5586_v44  ;;  %v3254_v48 = vpop.f32.mrb[43].mxu0 }
 0x460   : > { %3583 = vst.msk [vmem:[%s5605_s23 + $0x14] sm:$0xf] %vm3577_vm0, %v3970_v12  ;;  %v3393_v14 = vadd.f32 %v4312_v49, %v5591_v32  ;;  %v4314_v22 = vadd.f32 %v5586_v44, %v3254_v48 }
 0x461   : > { %v3427_v59 = vmax.f32 %v3395_v19, 0.0  ;;  %v3396_v43 = vadd.f32 %v4313_v13, %v5591_v32 }
 0x462   : > { %v3425_v1 = vmax.f32 %v3393_v14, 0.0  ;;  %v3394_v2 = vadd.f32 %v4314_v22, %v5591_v32 }
 0x463   : > { %v3975_v5 = vpack.c.bf16 %v3427_v59, %v3427_v59  ;;  %v3428_v16 = vmax.f32 %v3396_v43, 0.0 }
 0x464   : > { %v3973_v29 = vpack.c.bf16 %v3425_v1, %v3425_v1  ;;  %v3426_v37 = vmax.f32 %v3394_v2, 0.0  ;;  %v4285_v34 = vpop.f32.mrb[44].mxu0 }
 0x465   : > { %3588 = vst.msk [vmem:[%s5605_s23 + $0x28] sm:$0xf] %vm3577_vm0, %v3975_v5  ;;  %v3976_v57 = vpack.c.bf16 %v3428_v16, %v3428_v16  ;;  %v4315_v47 = vadd.f32 %v4285_v34, %v5586_v44  ;;  %v3267_v4 = vpop.f32.mrb[45].mxu0 }
 0x466   : > { %3586 = vst.msk [vmem:[%s5605_s23 + $0x20] sm:$0xf] %vm3577_vm0, %v3973_v29  ;;  %v3974_v27 = vpack.c.bf16 %v3426_v37, %v3426_v37  ;;  %v4316_v23 = vadd.f32 %v5586_v44, %v3267_v4  ;;  %v4286_v40 = vpop.f32.mrb[46].mxu0 }
 0x467   : > { %3589 = vst.msk [vmem:[%s5605_s23 + $0x2c] sm:$0xf] %vm3577_vm0, %v3976_v57  ;;  %v3399_v42 = vadd.f32 %v4315_v47, %v5591_v32  ;;  %v4317_v8 = vadd.f32 %v4286_v40, %v5586_v44  ;;  %v3270_v17 = vpop.f32.mrb[47].mxu0 }
 0x468   : > { %3587 = vst.msk [vmem:[%s5605_s23 + $0x24] sm:$0xf] %vm3577_vm0, %v3974_v27  ;;  %v3397_v26 = vadd.f32 %v4316_v23, %v5591_v32  ;;  %v4318_v55 = vadd.f32 %v5586_v44, %v3270_v17 }
 0x469   : > { %v3431_v52 = vmax.f32 %v3399_v42, 0.0  ;;  %v3400_v31 = vadd.f32 %v4317_v8, %v5591_v32 }
 0x46a   : > { %v3429_v15 = vmax.f32 %v3397_v26, 0.0  ;;  %v3398_v46 = vadd.f32 %v4318_v55, %v5591_v32 }
 0x46b   : > { %v3979_v18 = vpack.c.bf16 %v3431_v52, %v3431_v52  ;;  %v3432_v30 = vmax.f32 %v3400_v31, 0.0 }
 0x46c   : > { %v3977_v10 = vpack.c.bf16 %v3429_v15, %v3429_v15  ;;  %v3430_v51 = vmax.f32 %v3398_v46, 0.0  ;;  %v4289_v7 = vpop.f32.mrb[48].mxu0 }
 0x46d   : > { %3592 = vst.msk [vmem:[%s5605_s23 + $0x38] sm:$0xf] %vm3577_vm0, %v3979_v18  ;;  %v3980_v11 = vpack.c.bf16 %v3432_v30, %v3432_v30  ;;  %v4319_v24 = vadd.f32 %v4289_v7, %v5586_v44  ;;  %v3283_v21 = vpop.f32.mrb[49].mxu0 }
 0x46e   : > { %3590 = vst.msk [vmem:[%s5605_s23 + $0x30] sm:$0xf] %vm3577_vm0, %v3977_v10  ;;  %v3978_v60 = vpack.c.bf16 %v3430_v51, %v3430_v51  ;;  %v4320_v3 = vadd.f32 %v5586_v44, %v3283_v21  ;;  %v4290_v0 = vpop.f32.mrb[50].mxu0 }
 0x46f   : > { %3593 = vst.msk [vmem:[%s5605_s23 + $0x3c] sm:$0xf] %vm3577_vm0, %v3980_v11  ;;  %v3403_v58 = vadd.f32 %v4319_v24, %v5591_v32  ;;  %v4321_v61 = vadd.f32 %v4290_v0, %v5586_v44  ;;  %v3286_v45 = vpop.f32.mrb[51].mxu0 }
 0x470   : > { %3591 = vst.msk [vmem:[%s5605_s23 + $0x34] sm:$0xf] %vm3577_vm0, %v3978_v60  ;;  %v3401_v62 = vadd.f32 %v4320_v3, %v5591_v32  ;;  %v4322_v39 = vadd.f32 %v5586_v44, %v3286_v45 }
 0x471   : > { %v3435_v25 = vmax.f32 %v3403_v58, 0.0  ;;  %v3404_v28 = vadd.f32 %v4321_v61, %v5591_v32 }
 0x472   : > { %v3433_v33 = vmax.f32 %v3401_v62, 0.0  ;;  %v3402_v6 = vadd.f32 %v4322_v39, %v5591_v32 }
 0x473   : > { %v3983_v35 = vpack.c.bf16 %v3435_v25, %v3435_v25  ;;  %v3436_v9 = vmax.f32 %v3404_v28, 0.0 }
 0x474   : > { %v3981_v53 = vpack.c.bf16 %v3433_v33, %v3433_v33  ;;  %v3434_v63 = vmax.f32 %v3402_v6, 0.0  ;;  %v4293_v56 = vpop.f32.mrb[52].mxu0 }
 0x475   : > { %3596 = vst.msk [vmem:[%s5605_s23 + $0x48] sm:$0xf] %vm3577_vm0, %v3983_v35  ;;  %v3984_v41 = vpack.c.bf16 %v3436_v9, %v3436_v9  ;;  %v4323_v50 = vadd.f32 %v4293_v56, %v5586_v44  ;;  %v3299_v54 = vpop.f32.mrb[53].mxu0 }
 0x476   : > { %3594 = vst.msk [vmem:[%s5605_s23 + $0x40] sm:$0xf] %vm3577_vm0, %v3981_v53  ;;  %v3982_v36 = vpack.c.bf16 %v3434_v63, %v3434_v63  ;;  %v4324_v20 = vadd.f32 %v5586_v44, %v3299_v54  ;;  %v4294_v12 = vpop.f32.mrb[54].mxu0 }
 0x477   : > { %3597 = vst.msk [vmem:[%s5605_s23 + $0x4c] sm:$0xf] %vm3577_vm0, %v3984_v41  ;;  %v3407_v49 = vadd.f32 %v4323_v50, %v5591_v32  ;;  %v4325_v38 = vadd.f32 %v4294_v12, %v5586_v44  ;;  %v3302_v19 = vpop.f32.mrb[55].mxu0 }
 0x478   : > { %3595 = vst.msk [vmem:[%s5605_s23 + $0x44] sm:$0xf] %vm3577_vm0, %v3982_v36  ;;  %v3405_v13 = vadd.f32 %v4324_v20, %v5591_v32  ;;  %v4326_v48 = vadd.f32 %v5586_v44, %v3302_v19 }
 0x479   : > { %v3439_v14 = vmax.f32 %v3407_v49, 0.0  ;;  %v3408_v22 = vadd.f32 %v4325_v38, %v5591_v32 }
 0x47a   : > { %v3437_v59 = vmax.f32 %v3405_v13, 0.0  ;;  %v3406_v43 = vadd.f32 %v4326_v48, %v5591_v32 }
 0x47b   : > { %v3987_v1 = vpack.c.bf16 %v3439_v14, %v3439_v14  ;;  %v3440_v2 = vmax.f32 %v3408_v22, 0.0 }
 0x47c   : > { %v3985_v5 = vpack.c.bf16 %v3437_v59, %v3437_v59  ;;  %v3438_v16 = vmax.f32 %v3406_v43, 0.0  ;;  %v4297_v29 = vpop.f32.mrb[56].mxu0 }
 0x47d   : > { %3600 = vst.msk [vmem:[%s5605_s23 + $0x58] sm:$0xf] %vm3577_vm0, %v3987_v1  ;;  %v3988_v37 = vpack.c.bf16 %v3440_v2, %v3440_v2  ;;  %v4327_v34 = vadd.f32 %v4297_v29, %v5586_v44  ;;  %v3315_v57 = vpop.f32.mrb[57].mxu0 }
 0x47e   : > { %3598 = vst.msk [vmem:[%s5605_s23 + $0x50] sm:$0xf] %vm3577_vm0, %v3985_v5  ;;  %v3986_v47 = vpack.c.bf16 %v3438_v16, %v3438_v16  ;;  %v4328_v4 = vadd.f32 %v5586_v44, %v3315_v57  ;;  %v4298_v27 = vpop.f32.mrb[58].mxu0 }
 0x47f   : > { %3601 = vst.msk [vmem:[%s5605_s23 + $0x5c] sm:$0xf] %vm3577_vm0, %v3988_v37  ;;  %v3411_v23 = vadd.f32 %v4327_v34, %v5591_v32  ;;  %v4329_v40 = vadd.f32 %v4298_v27, %v5586_v44  ;;  %v3318_v42 = vpop.f32.mrb[59].mxu0 }
 0x480   : > { %3599 = vst.msk [vmem:[%s5605_s23 + $0x54] sm:$0xf] %vm3577_vm0, %v3986_v47  ;;  %v3409_v8 = vadd.f32 %v4328_v4, %v5591_v32  ;;  %v4330_v17 = vadd.f32 %v5586_v44, %v3318_v42 }
 0x481   : > { %v3443_v26 = vmax.f32 %v3411_v23, 0.0  ;;  %v3412_v55 = vadd.f32 %v4329_v40, %v5591_v32 }
 0x482   : > { %v3441_v52 = vmax.f32 %v3409_v8, 0.0  ;;  %v3410_v31 = vadd.f32 %v4330_v17, %v5591_v32 }
 0x483   : > { %v3991_v15 = vpack.c.bf16 %v3443_v26, %v3443_v26  ;;  %v3444_v46 = vmax.f32 %v3412_v55, 0.0 }
 0x484   : > { %v3989_v18 = vpack.c.bf16 %v3441_v52, %v3441_v52  ;;  %v3442_v30 = vmax.f32 %v3410_v31, 0.0  ;;  %v4301_v10 = vpop.f32.mrb[60].mxu0 }
 0x485   : > { %3604 = vst.msk [vmem:[%s5605_s23 + $0x68] sm:$0xf] %vm3577_vm0, %v3991_v15  ;;  %v3992_v51 = vpack.c.bf16 %v3444_v46, %v3444_v46  ;;  %v4331_v7 = vadd.f32 %v4301_v10, %v5586_v44  ;;  %v3331_v11 = vpop.f32.mrb[61].mxu0 }
 0x486   : > { %3602 = vst.msk [vmem:[%s5605_s23 + $0x60] sm:$0xf] %vm3577_vm0, %v3989_v18  ;;  %v3990_v24 = vpack.c.bf16 %v3442_v30, %v3442_v30  ;;  %v4332_v21 = vadd.f32 %v5586_v44, %v3331_v11  ;;  %v4302_v60 = vpop.f32.mrb[62].mxu0 }
 0x487   : > { %3605 = vst.msk [vmem:[%s5605_s23 + $0x6c] sm:$0xf] %vm3577_vm0, %v3992_v51  ;;  %v3415_v3 = vadd.f32 %v4331_v7, %v5591_v32  ;;  %v4333_v0 = vadd.f32 %v4302_v60, %v5586_v44  ;;  %v3334_v58 = vpop.f32.mrb[63].mxu0 }
 0x488   : > { %3603 = vst.msk [vmem:[%s5605_s23 + $0x64] sm:$0xf] %vm3577_vm0, %v3990_v24  ;;  %v3413_v61 = vadd.f32 %v4332_v21, %v5591_v32  ;;  %v4334_v45 = vadd.f32 %v5586_v44, %v3334_v58 }
 0x489   : > { %v3447_v62 = vmax.f32 %v3415_v3, 0.0  ;;  %v3416_v39 = vadd.f32 %v4333_v0, %v5591_v32 }
 0x48a   : > { %v3445_v25 = vmax.f32 %v3413_v61, 0.0  ;;  %v3414_v28 = vadd.f32 %v4334_v45, %v5591_v32 }
 0x48b   : > { %v3995_v33 = vpack.c.bf16 %v3447_v62, %v3447_v62  ;;  %v3448_v6 = vmax.f32 %v3416_v39, 0.0 }
 0x48c   : > { %v3993_v35 = vpack.c.bf16 %v3445_v25, %v3445_v25  ;;  %v3446_v9 = vmax.f32 %v3414_v28, 0.0 }
 0x48d   : > { %3608 = vst.msk [vmem:[%s5605_s23 + $0x78] sm:$0xf] %vm3577_vm0, %v3995_v33  ;;  %v3996_v53 = vpack.c.bf16 %v3448_v6, %v3448_v6 }
 0x48e   : > { %3606 = vst.msk [vmem:[%s5605_s23 + $0x70] sm:$0xf] %vm3577_vm0, %v3993_v35  ;;  %v3994_v63 = vpack.c.bf16 %v3446_v9, %v3446_v9 }
 0x48f   : > { %3609 = vst.msk [vmem:[%s5605_s23 + $0x7c] sm:$0xf] %vm3577_vm0, %v3996_v53 }
 0x490   : > { %3607 = vst.msk [vmem:[%s5605_s23 + $0x74] sm:$0xf] %vm3577_vm0, %v3994_v63 }
 0x491 PF: > { %s19_s30 = sadd.s32 1, %s4512_s30  }
 0x492   : > { %p16_p4 = scmp.ge.s32.totalorder %s19_s30, 4  }
 0x494   :  { %18 = sbr.rel (!%p16_p4) target bundleno = 1 (0x1), region = 87 }

</bundles_post_ra>
